<compile_context>
chip_gen: v6e
topology: v6e:2x2x1
jax: 0.10.0
libtpu: 0.0.40
codegen_flags: <defaults>
</compile_context>

<pallas_src>
import math
import functools

import jax
import jax.numpy as jnp
from jax.experimental import pallas as pl
from jax.experimental.pallas import tpu as pltpu

# ---- model hyper-parameters (small, consistent with the module defaults) ----
D = 32             # attention_dim
H = 4              # attention_heads
DK = D // H        # per-head dim
FF = 64            # linear_units
NUM_BLOCKS = 2     # num_blocks
EPS = 1e-12        # LayerNorm eps
NEG_BIAS = -1e30   # additive mask bias (safer than float32 min)

# Set to jnp.bfloat16 on v6e/v7x for MXU-native operands; keep f32 for v5e.
MATMUL_DTYPE = jnp.float32

# ---- packed bias/LN slab layout (one row = one vector, padded to 128 lanes) --
ROWS_PER_LAYER = 8
ROW_G1, ROW_B1, ROW_G2, ROW_B2, ROW_BQKV, ROW_BO, ROW_C1, ROW_C2 = range(8)


# ----------------------------- shared helper ---------------------------------
def _ln(x, g, b):
    """LayerNorm over last dim."""
    mu = jnp.mean(x, axis=-1, keepdims=True)
    xc = x - mu
    var = jnp.mean(xc * xc, axis=-1, keepdims=True)
    return xc * jax.lax.rsqrt(var + EPS) * g + b


# --------------------------------- kernel ------------------------------------
def transformer_block_kernel(x_ref, m_ref, pe_ref, small_ref,
                             wqkv_ref, wo_ref, w1_ref, w2_ref,
                             o_ref,
                             qkvh_ref, cmerge_ref,
                             *, scale, matmul_dtype):
    """posenc -> NUM_BLOCKS x EncoderLayer (pre-norm) -> after_norm.

    One grid step = one batch element (grid=(B,), "parallel" for v7x megacore).
    """
    T, Dm = x_ref.shape[1], x_ref.shape[2]

    def mm(a, b):
        return jnp.dot(a.astype(matmul_dtype), b.astype(matmul_dtype),
                       preferred_element_type=jnp.float32)

    # PositionalEncoding: x * sqrt(D) + pe  (positional dropout = identity)
    x = x_ref[0] * scale + pe_ref[...]                      # (T, D)

    # Hoisted once per call: additive key-mask bias + multiplicative keep mask.
    m = m_ref[...]                                          # (1, 1, T)
    mask_bias = jnp.where(m > 0.0, 0.0, NEG_BIAS)           # (1, 1, T)
    mask_keep = (m > 0.0).astype(jnp.float32)               # (1, 1, T)

    for l in range(NUM_BLOCKS):                # static unroll over encoder layers
        r = l * ROWS_PER_LAYER
        g1 = small_ref[r + ROW_G1:r + ROW_G1 + 1, :Dm]
        b1 = small_ref[r + ROW_B1:r + ROW_B1 + 1, :Dm]
        g2 = small_ref[r + ROW_G2:r + ROW_G2 + 1, :Dm]
        b2 = small_ref[r + ROW_B2:r + ROW_B2 + 1, :Dm]
        bqkv = small_ref[r + ROW_BQKV:r + ROW_BQKV + 1, :3 * Dm]
        bo = small_ref[r + ROW_BO:r + ROW_BO + 1, :Dm]
        c1 = small_ref[r + ROW_C1:r + ROW_C1 + 1, :FF]
        c2 = small_ref[r + ROW_C2:r + ROW_C2 + 1, :Dm]

        # ---- multi-headed self-attention sub-layer (pre-norm + residual) ----
        xn = _ln(x, g1, b1)
        # Fused qkv projection; 1/sqrt(DK) was folded into the q columns.
        qkv = mm(xn, wqkv_ref[l]) + bqkv                    # (T, 3D)

        # Head-major relayout through VMEM scratch: (T, 3D) -> q/k/v (H, T, DK).
        for idx in range(3):                                # q, k, v
            off = idx * Dm
            for h in range(H):
                qkvh_ref[idx * H + h] = qkv[:, off + h * DK: off + (h + 1) * DK]
        q = qkvh_ref[0:H]                                   # (H, T, DK)
        k = qkvh_ref[H:2 * H]                               # (H, T, DK)
        v = qkvh_ref[2 * H:3 * H]                           # (H, T, DK)

        # All heads in one batched einsum pair (documented Mosaic patterns).
        s = jnp.einsum('hqd,hkd->hqk',
                       q.astype(matmul_dtype), k.astype(matmul_dtype),
                       preferred_element_type=jnp.float32)  # (H, T, T)
        s = s + mask_bias                                   # masked_fill(min) equiv.
        p = jnp.exp(s - jnp.max(s, axis=-1, keepdims=True))
        attn = p * pl.reciprocal(jnp.sum(p, axis=-1, keepdims=True), approx=True)
        attn = attn * mask_keep                             # masked_fill(0.0)
        ctx = jnp.einsum('hqk,hkd->hqd',
                         attn.astype(matmul_dtype), v.astype(matmul_dtype),
                         preferred_element_type=jnp.float32)  # (H, T, DK)

        # Merge heads back to (T, D) through scratch, then ONE Wo matmul.
        for h in range(H):
            cmerge_ref[:, h * DK:(h + 1) * DK] = ctx[h]
        ctx2 = cmerge_ref[...]                              # (T, D)
        x = x + mm(ctx2, wo_ref[l]) + bo

        # ---- position-wise feed-forward sub-layer (pre-norm + residual) ----
        xn2 = _ln(x, g2, b2)
        h1 = jnp.maximum(mm(xn2, w1_ref[l]) + c1, 0.0)      # (T, FF)
        x = x + mm(h1, w2_ref[l]) + c2

    # ---- after_norm (normalize_before=True) ----
    ra = NUM_BLOCKS * ROWS_PER_LAYER
    y = _ln(x, small_ref[ra:ra + 1, :Dm], small_ref[ra + 1:ra + 2, :Dm])
    o_ref[...] = y[None, :, :]


# ------------------------------ Pallas wrapper --------------------------------
def transformer_block_forward(xs, masks, packed):
    """Pallas implementation of TransformerBlock.forward (eval mode)."""
    B, T, Dm = xs.shape
    pe = sinusoidal_pe(T, Dm)
    small, wqkv, wo, w1, w2 = (packed["small"], packed["wqkv"], packed["wo"],
                               packed["w1"], packed["w2"])

    def full_spec(arr):
        nd = arr.ndim
        return pl.BlockSpec(arr.shape, lambda b, _nd=nd: (0,) * _nd)

    out = pl.pallas_call(
        functools.partial(transformer_block_kernel,
                          scale=math.sqrt(Dm), matmul_dtype=MATMUL_DTYPE),
        out_shape=jax.ShapeDtypeStruct(xs.shape, xs.dtype),
        grid=(B,),
        in_specs=[
            pl.BlockSpec((1, T, Dm), lambda b: (b, 0, 0)),   # x: one batch element
            pl.BlockSpec((1, 1, T), lambda b: (b, 0, 0)),    # mask
            full_spec(pe),                                   # resident across steps
            full_spec(small),
            full_spec(wqkv),
            full_spec(wo),
            full_spec(w1),
            full_spec(w2),
        ],
        out_specs=pl.BlockSpec((1, T, Dm), lambda b: (b, 0, 0)),
        scratch_shapes=[
            pltpu.VMEM((3 * H, T, DK), jnp.float32),   # head-major q/k/v relayout
            pltpu.VMEM((T, D), jnp.float32),           # head-merge buffer
        ],
        compiler_params=pltpu.CompilerParams(
            dimension_semantics=("parallel",),
            vmem_limit_bytes=32 * 1024 * 1024),
    )(xs, masks, pe, small, wqkv, wo, w1, w2)
    return out, masks


# ----------------------------- parameter / PE setup ---------------------------
def sinusoidal_pe(T, Dm):
    pos = jnp.arange(T, dtype=jnp.float32)[:, None]
    div = jnp.exp(jnp.arange(0, Dm, 2, dtype=jnp.float32) *
                  -(math.log(10000.0) / Dm))
    pe = jnp.zeros((T, Dm), jnp.float32)
    pe = pe.at[:, 0::2].set(jnp.sin(pos * div))
    pe = pe.at[:, 1::2].set(jnp.cos(pos * div))
    return pe


def init_params(key):
    """Raw parameters, laid out like the PyTorch module (used by the reference)."""
    L = NUM_BLOCKS
    k = jax.random.split(key, 12)

    def rnd(kk, shape, s=0.05):
        return s * jax.random.normal(kk, shape, jnp.float32)

    g = 1.0 + 0.1 * jax.random.normal(k[0], (L, 2, D), jnp.float32)   # ln gains
    b = 0.1 * jax.random.normal(k[1], (L, 2, D), jnp.float32)         # ln biases
    ln = jnp.stack([g[:, 0], b[:, 0], g[:, 1], b[:, 1]], axis=1)      # (L, 4, D)

    return {
        "ln": ln,
        "wqkv": rnd(k[2], (L, D, 3 * D)),     # [Wq | Wk | Wv] fused
        "bqkv": rnd(k[3], (L, 1, 3 * D)),
        "wo": rnd(k[4], (L, D, D)),
        "bo": rnd(k[5], (L, 1, D)),
        "w1": rnd(k[6], (L, D, FF)),
        "c1": rnd(k[7], (L, 1, FF)),
        "w2": rnd(k[8], (L, FF, D)),
        "c2": rnd(k[9], (L, 1, D)),
        "after_ln": jnp.stack([
            1.0 + 0.1 * jax.random.normal(k[10], (D,), jnp.float32),
            0.1 * jax.random.normal(k[11], (D,), jnp.float32)], axis=0),  # (2, D)
    }


def pack_params(p):
    """One-time parameter prep for the kernel:
       * fold 1/sqrt(DK) into the q columns of Wqkv / bqkv,
       * pack all LN gains/biases + linear biases into one (rows, 128) slab."""
    L = NUM_BLOCKS
    n_rows = L * ROWS_PER_LAYER + 2
    rows = ((n_rows + 7) // 8) * 8
    small = jnp.zeros((rows, 128), jnp.float32)

    inv = 1.0 / math.sqrt(DK)
    wqkv = p["wqkv"].at[:, :, :D].multiply(inv)
    bqkv = p["bqkv"].at[:, :, :D].multiply(inv)

    for l in range(L):
        r = l * ROWS_PER_LAYER
        small = small.at[r + ROW_G1, :D].set(p["ln"][l, 0])
        small = small.at[r + ROW_B1, :D].set(p["ln"][l, 1])
        small = small.at[r + ROW_G2, :D].set(p["ln"][l, 2])
        small = small.at[r + ROW_B2, :D].set(p["ln"][l, 3])
        small = small.at[r + ROW_BQKV, :3 * D].set(bqkv[l, 0])
        small = small.at[r + ROW_BO, :D].set(p["bo"][l, 0])
        small = small.at[r + ROW_C1, :FF].set(p["c1"][l, 0])
        small = small.at[r + ROW_C2, :D].set(p["c2"][l, 0])
    ra = L * ROWS_PER_LAYER
    small = small.at[ra, :D].set(p["after_ln"][0])
    small = small.at[ra + 1, :D].set(p["after_ln"][1])

    return {"small": small, "wqkv": wqkv, "wo": p["wo"],
            "w1": p["w1"], "w2": p["w2"]}


# ------------------------------ pure-JAX reference ----------------------------
def _ref_forward(xs, masks, params):
    B, T, Dm = xs.shape
    x = xs * math.sqrt(Dm) + sinusoidal_pe(T, Dm)[None]
    mk = (masks > 0.0)[:, None, :, :]                 # (B, 1, 1, T)
    for l in range(NUM_BLOCKS):
        g1 = params["ln"][l, 0][None, None, :]
        b1 = params["ln"][l, 1][None, None, :]
        g2 = params["ln"][l, 2][None, None, :]
        b2 = params["ln"][l, 3][None, None, :]

        xn = _ln(x, g1, b1)
        qkv = xn @ params["wqkv"][l] + params["bqkv"][l]
        q, k, v = jnp.split(qkv, 3, axis=-1)

        def heads(t):
            return t.reshape(B, T, H, DK).transpose(0, 2, 1, 3)
        q, k, v = heads(q), heads(k), heads(v)
        sc = jnp.einsum("bhqd,bhkd->bhqk", q, k) / math.sqrt(DK)
        sc = jnp.where(mk, sc, NEG_BIAS)
        at = jax.nn.softmax(sc, axis=-1)
        at = jnp.where(mk, at, 0.0)
        ctx = jnp.einsum("bhqk,bhkd->bhqd", at, v).transpose(0, 2, 1, 3)
        ctx = ctx.reshape(B, T, Dm)
        x = x + ctx @ params["wo"][l] + params["bo"][l]

        xn2 = _ln(x, g2, b2)
        x = x + (jnp.maximum(xn2 @ params["w1"][l] + params["c1"][l], 0.0)
                 @ params["w2"][l] + params["c2"][l])
    x = _ln(x, params["after_ln"][0][None, None, :],
            params["after_ln"][1][None, None, :])
    return x, masks


# ------------------------------------ main ------------------------------------
if __name__ == "__main__":
    B, T = 2, 8
    key = jax.random.PRNGKey(0)
    kx, kp = jax.random.split(key)
    xs = jax.random.normal(kx, (B, T, D), jnp.float32)
    masks = jnp.ones((B, 1, T), jnp.float32).at[1, :, -2:].set(0.0)

    params = init_params(kp)
    packed = pack_params(params)          # one-time parameter prep (not per call)

    out, out_masks = transformer_block_forward(xs, masks, packed)
    out = jax.block_until_ready(out)
    out_masks = jax.block_until_ready(out_masks)

    ref, _ = _ref_forward(xs, masks, params)
    assert out.shape == (B, T, D) and out_masks.shape == masks.shape
    assert jnp.allclose(out, ref, atol=1e-2, rtol=1e-2), "mismatch vs reference"
    print("KERNEL_OK")
</pallas_src>

<mosaic_0001>
module attributes {stable_mosaic.version = 11 : i64} {
  func.func @transformer_block_kernel(%arg0: i32, %arg1: memref<1x8x32xf32, #tpu.memory_space<vmem>>, %arg2: memref<1x1x8xf32, #tpu.memory_space<vmem>>, %arg3: memref<8x32xf32, #tpu.memory_space<vmem>>, %arg4: memref<24x128xf32, #tpu.memory_space<vmem>>, %arg5: memref<2x32x96xf32, #tpu.memory_space<vmem>>, %arg6: memref<2x32x32xf32, #tpu.memory_space<vmem>>, %arg7: memref<2x32x64xf32, #tpu.memory_space<vmem>>, %arg8: memref<2x64x32xf32, #tpu.memory_space<vmem>>, %arg9: memref<1x8x32xf32, #tpu.memory_space<vmem>>, %arg10: memref<12x8x8xf32, #tpu.memory_space<vmem>>, %arg11: memref<8x32xf32, #tpu.memory_space<vmem>>) attributes {dimension_semantics = [#tpu.dimension_semantics<parallel>], iteration_bounds = array<i64: 2>, scalar_prefetch = 0 : i64, scratch_operands = 2 : i64, tpu.core_type = #tpu.core_type<tc>, window_params = [{transform_indices = @transform_0, window_bounds = array<i64: 1, 8, 32>}, {transform_indices = @transform_1, window_bounds = array<i64: 1, 1, 8>}, {pipeline_mode = #tpu.pipeline_mode<synchronous>, transform_indices = @transform_2, window_bounds = array<i64: 8, 32>}, {pipeline_mode = #tpu.pipeline_mode<synchronous>, transform_indices = @transform_3, window_bounds = array<i64: 24, 128>}, {pipeline_mode = #tpu.pipeline_mode<synchronous>, transform_indices = @transform_4, window_bounds = array<i64: 2, 32, 96>}, {pipeline_mode = #tpu.pipeline_mode<synchronous>, transform_indices = @transform_5, window_bounds = array<i64: 2, 32, 32>}, {pipeline_mode = #tpu.pipeline_mode<synchronous>, transform_indices = @transform_6, window_bounds = array<i64: 2, 32, 64>}, {pipeline_mode = #tpu.pipeline_mode<synchronous>, transform_indices = @transform_7, window_bounds = array<i64: 2, 64, 32>}, {transform_indices = @transform_8, window_bounds = array<i64: 1, 8, 32>}]} {
    %c0 = arith.constant 0 : index
    %c0_0 = arith.constant 0 : index
    %c0_1 = arith.constant 0 : index
    %0 = vector.load %arg1[%c0, %c0_0, %c0_1] : memref<1x8x32xf32, #tpu.memory_space<vmem>>, vector<1x8x32xf32>
    %1 = vector.shape_cast %0 : vector<1x8x32xf32> to vector<8x32xf32>
    %cst = arith.constant 5.65685415 : f32
    %2 = vector.broadcast %cst : f32 to vector<8x32xf32>
    %3 = arith.mulf %1, %2 : vector<8x32xf32>
    %c0_2 = arith.constant 0 : index
    %c0_3 = arith.constant 0 : index
    %4 = vector.load %arg3[%c0_2, %c0_3] : memref<8x32xf32, #tpu.memory_space<vmem>>, vector<8x32xf32>
    %5 = arith.addf %3, %4 : vector<8x32xf32>
    %c0_4 = arith.constant 0 : index
    %c0_5 = arith.constant 0 : index
    %c0_6 = arith.constant 0 : index
    %6 = vector.load %arg2[%c0_4, %c0_5, %c0_6] : memref<1x1x8xf32, #tpu.memory_space<vmem>>, vector<1x1x8xf32>
    %cst_7 = arith.constant 0.000000e+00 : f32
    %7 = vector.broadcast %cst_7 : f32 to vector<1x1x8xf32>
    %8 = arith.cmpf ogt, %6, %7 : vector<1x1x8xf32>
    %cst_8 = arith.constant 0.000000e+00 : f32
    %cst_9 = arith.constant -1.000000e+30 : f32
    %9 = vector.broadcast %cst_8 : f32 to vector<1x1x8xf32>
    %10 = vector.broadcast %cst_9 : f32 to vector<1x1x8xf32>
    %11 = arith.select %8, %9, %10 : vector<1x1x8xi1>, vector<1x1x8xf32>
    %cst_10 = arith.constant 0.000000e+00 : f32
    %12 = vector.broadcast %cst_10 : f32 to vector<1x1x8xf32>
    %13 = arith.cmpf ogt, %6, %12 : vector<1x1x8xf32>
    %14 = arith.extui %13 : vector<1x1x8xi1> to vector<1x1x8xi32>
    %15 = arith.sitofp %14 : vector<1x1x8xi32> to vector<1x1x8xf32>
    %c0_11 = arith.constant 0 : index
    %c0_12 = arith.constant 0 : index
    %16 = vector.load %arg4[%c0_11, %c0_12] : memref<24x128xf32, #tpu.memory_space<vmem>>, vector<1x32xf32>
    %c1 = arith.constant 1 : index
    %c0_13 = arith.constant 0 : index
    %17 = vector.load %arg4[%c1, %c0_13] : memref<24x128xf32, #tpu.memory_space<vmem>>, vector<1x32xf32>
    %c2 = arith.constant 2 : index
    %c0_14 = arith.constant 0 : index
    %18 = vector.load %arg4[%c2, %c0_14] : memref<24x128xf32, #tpu.memory_space<vmem>>, vector<1x32xf32>
    %c3 = arith.constant 3 : index
    %c0_15 = arith.constant 0 : index
    %19 = vector.load %arg4[%c3, %c0_15] : memref<24x128xf32, #tpu.memory_space<vmem>>, vector<1x32xf32>
    %c4 = arith.constant 4 : index
    %c0_16 = arith.constant 0 : index
    %20 = vector.load %arg4[%c4, %c0_16] : memref<24x128xf32, #tpu.memory_space<vmem>>, vector<1x96xf32>
    %c5 = arith.constant 5 : index
    %c0_17 = arith.constant 0 : index
    %21 = vector.load %arg4[%c5, %c0_17] : memref<24x128xf32, #tpu.memory_space<vmem>>, vector<1x32xf32>
    %c6 = arith.constant 6 : index
    %c0_18 = arith.constant 0 : index
    %22 = vector.load %arg4[%c6, %c0_18] : memref<24x128xf32, #tpu.memory_space<vmem>>, vector<1x64xf32>
    %c7 = arith.constant 7 : index
    %c0_19 = arith.constant 0 : index
    %23 = vector.load %arg4[%c7, %c0_19] : memref<24x128xf32, #tpu.memory_space<vmem>>, vector<1x32xf32>
    %cst_20 = arith.constant dense<0.000000e+00> : vector<8xf32>
    %24 = vector.multi_reduction <add>, %5, %cst_20 [1] : vector<8x32xf32> to vector<8xf32>
    %25 = vector.shape_cast %24 : vector<8xf32> to vector<8x1xf32>
    %cst_21 = arith.constant 3.200000e+01 : f32
    %26 = vector.broadcast %cst_21 : f32 to vector<8x1xf32>
    %27 = arith.divf %25, %26 : vector<8x1xf32>
    %28 = vector.broadcast %27 : vector<8x1xf32> to vector<8x32xf32>
    %29 = arith.subf %5, %28 : vector<8x32xf32>
    %30 = arith.mulf %29, %29 : vector<8x32xf32>
    %cst_22 = arith.constant dense<0.000000e+00> : vector<8xf32>
    %31 = vector.multi_reduction <add>, %30, %cst_22 [1] : vector<8x32xf32> to vector<8xf32>
    %32 = vector.shape_cast %31 : vector<8xf32> to vector<8x1xf32>
    %cst_23 = arith.constant 3.200000e+01 : f32
    %33 = vector.broadcast %cst_23 : f32 to vector<8x1xf32>
    %34 = arith.divf %32, %33 : vector<8x1xf32>
    %cst_24 = arith.constant 9.99999996E-13 : f32
    %35 = vector.broadcast %cst_24 : f32 to vector<8x1xf32>
    %36 = arith.addf %34, %35 : vector<8x1xf32>
    %37 = math.rsqrt %36 : vector<8x1xf32>
    %38 = vector.broadcast %37 : vector<8x1xf32> to vector<8x32xf32>
    %39 = arith.mulf %29, %38 : vector<8x32xf32>
    %40 = vector.broadcast %16 : vector<1x32xf32> to vector<8x32xf32>
    %41 = arith.mulf %39, %40 : vector<8x32xf32>
    %42 = vector.broadcast %17 : vector<1x32xf32> to vector<8x32xf32>
    %43 = arith.addf %41, %42 : vector<8x32xf32>
    %c0_25 = arith.constant 0 : index
    %c0_26 = arith.constant 0 : index
    %c0_27 = arith.constant 0 : index
    %44 = vector.load %arg5[%c0_25, %c0_26, %c0_27] : memref<2x32x96xf32, #tpu.memory_space<vmem>>, vector<1x32x96xf32>
    %45 = vector.shape_cast %44 : vector<1x32x96xf32> to vector<32x96xf32>
    %cst_28 = arith.constant dense<0.000000e+00> : vector<8x96xf32>
    %46 = tpu.matmul %43, %45, %cst_28 {dimension_numbers = #tpu.dot_dimension_numbers<[1], [0], [0], [1], [0, 0, 1, 1], [], []>} : vector<8x32xf32>, vector<32x96xf32>, vector<8x96xf32> -> vector<8x96xf32>
    %47 = vector.broadcast %20 : vector<1x96xf32> to vector<8x96xf32>
    %48 = arith.addf %46, %47 : vector<8x96xf32>
    %49 = vector.extract_strided_slice %48 {offsets = [0, 0], sizes = [8, 8], strides = [1, 1]} : vector<8x96xf32> to vector<8x8xf32>
    %c0_29 = arith.constant 0 : index
    %c0_30 = arith.constant 0 : index
    %c0_31 = arith.constant 0 : index
    %50 = vector.load %arg10[%c0_29, %c0_30, %c0_31] : memref<12x8x8xf32, #tpu.memory_space<vmem>>, vector<1x8x8xf32>
    %51 = vector.shape_cast %50 : vector<1x8x8xf32> to vector<8x8xf32>
    %52 = vector.shape_cast %49 : vector<8x8xf32> to vector<1x8x8xf32>
    tpu.vector_store %arg10[%c0_29, %c0_30, %c0_31], %52 {strides = array<i32>} : memref<12x8x8xf32, #tpu.memory_space<vmem>>, vector<1x8x8xf32>,
    %53 = vector.extract_strided_slice %48 {offsets = [0, 8], sizes = [8, 8], strides = [1, 1]} : vector<8x96xf32> to vector<8x8xf32>
    %c1_32 = arith.constant 1 : index
    %c0_33 = arith.constant 0 : index
    %c0_34 = arith.constant 0 : index
    %54 = vector.load %arg10[%c1_32, %c0_33, %c0_34] : memref<12x8x8xf32, #tpu.memory_space<vmem>>, vector<1x8x8xf32>
    %55 = vector.shape_cast %54 : vector<1x8x8xf32> to vector<8x8xf32>
    %56 = vector.shape_cast %53 : vector<8x8xf32> to vector<1x8x8xf32>
    tpu.vector_store %arg10[%c1_32, %c0_33, %c0_34], %56 {strides = array<i32>} : memref<12x8x8xf32, #tpu.memory_space<vmem>>, vector<1x8x8xf32>,
    %57 = vector.extract_strided_slice %48 {offsets = [0, 16], sizes = [8, 8], strides = [1, 1]} : vector<8x96xf32> to vector<8x8xf32>
    %c2_35 = arith.constant 2 : index
    %c0_36 = arith.constant 0 : index
    %c0_37 = arith.constant 0 : index
    %58 = vector.load %arg10[%c2_35, %c0_36, %c0_37] : memref<12x8x8xf32, #tpu.memory_space<vmem>>, vector<1x8x8xf32>
    %59 = vector.shape_cast %58 : vector<1x8x8xf32> to vector<8x8xf32>
    %60 = vector.shape_cast %57 : vector<8x8xf32> to vector<1x8x8xf32>
    tpu.vector_store %arg10[%c2_35, %c0_36, %c0_37], %60 {strides = array<i32>} : memref<12x8x8xf32, #tpu.memory_space<vmem>>, vector<1x8x8xf32>,
    %61 = vector.extract_strided_slice %48 {offsets = [0, 24], sizes = [8, 8], strides = [1, 1]} : vector<8x96xf32> to vector<8x8xf32>
    %c3_38 = arith.constant 3 : index
    %c0_39 = arith.constant 0 : index
    %c0_40 = arith.constant 0 : index
    %62 = vector.load %arg10[%c3_38, %c0_39, %c0_40] : memref<12x8x8xf32, #tpu.memory_space<vmem>>, vector<1x8x8xf32>
    %63 = vector.shape_cast %62 : vector<1x8x8xf32> to vector<8x8xf32>
    %64 = vector.shape_cast %61 : vector<8x8xf32> to vector<1x8x8xf32>
    tpu.vector_store %arg10[%c3_38, %c0_39, %c0_40], %64 {strides = array<i32>} : memref<12x8x8xf32, #tpu.memory_space<vmem>>, vector<1x8x8xf32>,
    %65 = vector.extract_strided_slice %48 {offsets = [0, 32], sizes = [8, 8], strides = [1, 1]} : vector<8x96xf32> to vector<8x8xf32>
    %c4_41 = arith.constant 4 : index
    %c0_42 = arith.constant 0 : index
    %c0_43 = arith.constant 0 : index
    %66 = vector.load %arg10[%c4_41, %c0_42, %c0_43] : memref<12x8x8xf32, #tpu.memory_space<vmem>>, vector<1x8x8xf32>
    %67 = vector.shape_cast %66 : vector<1x8x8xf32> to vector<8x8xf32>
    %68 = vector.shape_cast %65 : vector<8x8xf32> to vector<1x8x8xf32>
    tpu.vector_store %arg10[%c4_41, %c0_42, %c0_43], %68 {strides = array<i32>} : memref<12x8x8xf32, #tpu.memory_space<vmem>>, vector<1x8x8xf32>,
    %69 = vector.extract_strided_slice %48 {offsets = [0, 40], sizes = [8, 8], strides = [1, 1]} : vector<8x96xf32> to vector<8x8xf32>
    %c5_44 = arith.constant 5 : index
    %c0_45 = arith.constant 0 : index
    %c0_46 = arith.constant 0 : index
    %70 = vector.load %arg10[%c5_44, %c0_45, %c0_46] : memref<12x8x8xf32, #tpu.memory_space<vmem>>, vector<1x8x8xf32>
    %71 = vector.shape_cast %70 : vector<1x8x8xf32> to vector<8x8xf32>
    %72 = vector.shape_cast %69 : vector<8x8xf32> to vector<1x8x8xf32>
    tpu.vector_store %arg10[%c5_44, %c0_45, %c0_46], %72 {strides = array<i32>} : memref<12x8x8xf32, #tpu.memory_space<vmem>>, vector<1x8x8xf32>,
    %73 = vector.extract_strided_slice %48 {offsets = [0, 48], sizes = [8, 8], strides = [1, 1]} : vector<8x96xf32> to vector<8x8xf32>
    %c6_47 = arith.constant 6 : index
    %c0_48 = arith.constant 0 : index
    %c0_49 = arith.constant 0 : index
    %74 = vector.load %arg10[%c6_47, %c0_48, %c0_49] : memref<12x8x8xf32, #tpu.memory_space<vmem>>, vector<1x8x8xf32>
    %75 = vector.shape_cast %74 : vector<1x8x8xf32> to vector<8x8xf32>
    %76 = vector.shape_cast %73 : vector<8x8xf32> to vector<1x8x8xf32>
    tpu.vector_store %arg10[%c6_47, %c0_48, %c0_49], %76 {strides = array<i32>} : memref<12x8x8xf32, #tpu.memory_space<vmem>>, vector<1x8x8xf32>,
    %77 = vector.extract_strided_slice %48 {offsets = [0, 56], sizes = [8, 8], strides = [1, 1]} : vector<8x96xf32> to vector<8x8xf32>
    %c7_50 = arith.constant 7 : index
    %c0_51 = arith.constant 0 : index
    %c0_52 = arith.constant 0 : index
    %78 = vector.load %arg10[%c7_50, %c0_51, %c0_52] : memref<12x8x8xf32, #tpu.memory_space<vmem>>, vector<1x8x8xf32>
    %79 = vector.shape_cast %78 : vector<1x8x8xf32> to vector<8x8xf32>
    %80 = vector.shape_cast %77 : vector<8x8xf32> to vector<1x8x8xf32>
    tpu.vector_store %arg10[%c7_50, %c0_51, %c0_52], %80 {strides = array<i32>} : memref<12x8x8xf32, #tpu.memory_space<vmem>>, vector<1x8x8xf32>,
    %81 = vector.extract_strided_slice %48 {offsets = [0, 64], sizes = [8, 8], strides = [1, 1]} : vector<8x96xf32> to vector<8x8xf32>
    %c8 = arith.constant 8 : index
    %c0_53 = arith.constant 0 : index
    %c0_54 = arith.constant 0 : index
    %82 = vector.load %arg10[%c8, %c0_53, %c0_54] : memref<12x8x8xf32, #tpu.memory_space<vmem>>, vector<1x8x8xf32>
    %83 = vector.shape_cast %82 : vector<1x8x8xf32> to vector<8x8xf32>
    %84 = vector.shape_cast %81 : vector<8x8xf32> to vector<1x8x8xf32>
    tpu.vector_store %arg10[%c8, %c0_53, %c0_54], %84 {strides = array<i32>} : memref<12x8x8xf32, #tpu.memory_space<vmem>>, vector<1x8x8xf32>,
    %85 = vector.extract_strided_slice %48 {offsets = [0, 72], sizes = [8, 8], strides = [1, 1]} : vector<8x96xf32> to vector<8x8xf32>
    %c9 = arith.constant 9 : index
    %c0_55 = arith.constant 0 : index
    %c0_56 = arith.constant 0 : index
    %86 = vector.load %arg10[%c9, %c0_55, %c0_56] : memref<12x8x8xf32, #tpu.memory_space<vmem>>, vector<1x8x8xf32>
    %87 = vector.shape_cast %86 : vector<1x8x8xf32> to vector<8x8xf32>
    %88 = vector.shape_cast %85 : vector<8x8xf32> to vector<1x8x8xf32>
    tpu.vector_store %arg10[%c9, %c0_55, %c0_56], %88 {strides = array<i32>} : memref<12x8x8xf32, #tpu.memory_space<vmem>>, vector<1x8x8xf32>,
    %89 = vector.extract_strided_slice %48 {offsets = [0, 80], sizes = [8, 8], strides = [1, 1]} : vector<8x96xf32> to vector<8x8xf32>
    %c10 = arith.constant 10 : index
    %c0_57 = arith.constant 0 : index
    %c0_58 = arith.constant 0 : index
    %90 = vector.load %arg10[%c10, %c0_57, %c0_58] : memref<12x8x8xf32, #tpu.memory_space<vmem>>, vector<1x8x8xf32>
    %91 = vector.shape_cast %90 : vector<1x8x8xf32> to vector<8x8xf32>
    %92 = vector.shape_cast %89 : vector<8x8xf32> to vector<1x8x8xf32>
    tpu.vector_store %arg10[%c10, %c0_57, %c0_58], %92 {strides = array<i32>} : memref<12x8x8xf32, #tpu.memory_space<vmem>>, vector<1x8x8xf32>,
    %93 = vector.extract_strided_slice %48 {offsets = [0, 88], sizes = [8, 8], strides = [1, 1]} : vector<8x96xf32> to vector<8x8xf32>
    %c11 = arith.constant 11 : index
    %c0_59 = arith.constant 0 : index
    %c0_60 = arith.constant 0 : index
    %94 = vector.load %arg10[%c11, %c0_59, %c0_60] : memref<12x8x8xf32, #tpu.memory_space<vmem>>, vector<1x8x8xf32>
    %95 = vector.shape_cast %94 : vector<1x8x8xf32> to vector<8x8xf32>
    %96 = vector.shape_cast %93 : vector<8x8xf32> to vector<1x8x8xf32>
    tpu.vector_store %arg10[%c11, %c0_59, %c0_60], %96 {strides = array<i32>} : memref<12x8x8xf32, #tpu.memory_space<vmem>>, vector<1x8x8xf32>,
    %c0_61 = arith.constant 0 : index
    %c0_62 = arith.constant 0 : index
    %c0_63 = arith.constant 0 : index
    %97 = vector.load %arg10[%c0_61, %c0_62, %c0_63] : memref<12x8x8xf32, #tpu.memory_space<vmem>>, vector<4x8x8xf32>
    %c4_64 = arith.constant 4 : index
    %c0_65 = arith.constant 0 : index
    %c0_66 = arith.constant 0 : index
    %98 = vector.load %arg10[%c4_64, %c0_65, %c0_66] : memref<12x8x8xf32, #tpu.memory_space<vmem>>, vector<4x8x8xf32>
    %c8_67 = arith.constant 8 : index
    %c0_68 = arith.constant 0 : index
    %c0_69 = arith.constant 0 : index
    %99 = vector.load %arg10[%c8_67, %c0_68, %c0_69] : memref<12x8x8xf32, #tpu.memory_space<vmem>>, vector<4x8x8xf32>
    "tpu.trace_start"() <{level = 10 : i32, message = "hqd,hkd->hqk"}> : () -> ()
    %cst_70 = arith.constant dense<0.000000e+00> : vector<4x8x8xf32>
    %100 = tpu.matmul %97, %98, %cst_70 {dimension_numbers = #tpu.dot_dimension_numbers<[2], [2], [1], [1], [0, 0, 0, 1, 1, 1], [0], [0]>} : vector<4x8x8xf32>, vector<4x8x8xf32>, vector<4x8x8xf32> -> vector<4x8x8xf32>
    "tpu.trace_stop"() : () -> ()
    %101 = vector.broadcast %11 : vector<1x1x8xf32> to vector<4x8x8xf32>
    %102 = arith.addf %100, %101 : vector<4x8x8xf32>
    %cst_71 = arith.constant dense<0xFF800000> : vector<4x8xf32>
    %103 = vector.multi_reduction <maximumf>, %102, %cst_71 [2] : vector<4x8x8xf32> to vector<4x8xf32>
    %104 = vector.shape_cast %103 : vector<4x8xf32> to vector<4x8x1xf32>
    %105 = vector.broadcast %104 : vector<4x8x1xf32> to vector<4x8x8xf32>
    %106 = arith.subf %102, %105 : vector<4x8x8xf32>
    %107 = math.exp %106 : vector<4x8x8xf32>
    %cst_72 = arith.constant dense<0.000000e+00> : vector<4x8xf32>
    %108 = vector.multi_reduction <add>, %107, %cst_72 [2] : vector<4x8x8xf32> to vector<4x8xf32>
    %109 = vector.shape_cast %108 : vector<4x8xf32> to vector<4x8x1xf32>
    %110 = tpu.reciprocal %109 {approx = true} : vector<4x8x1xf32> -> vector<4x8x1xf32>
    %111 = vector.broadcast %110 : vector<4x8x1xf32> to vector<4x8x8xf32>
    %112 = arith.mulf %107, %111 : vector<4x8x8xf32>
    %113 = vector.broadcast %15 : vector<1x1x8xf32> to vector<4x8x8xf32>
    %114 = arith.mulf %112, %113 : vector<4x8x8xf32>
    "tpu.trace_start"() <{level = 10 : i32, message = "hqk,hkd->hqd"}> : () -> ()
    %cst_73 = arith.constant dense<0.000000e+00> : vector<4x8x8xf32>
    %115 = tpu.matmul %114, %99, %cst_73 {dimension_numbers = #tpu.dot_dimension_numbers<[2], [1], [1], [2], [0, 0, 0, 1, 1, 2], [0], [0]>} : vector<4x8x8xf32>, vector<4x8x8xf32>, vector<4x8x8xf32> -> vector<4x8x8xf32>
    "tpu.trace_stop"() : () -> ()
    %116 = vector.extract_strided_slice %115 {offsets = [0, 0, 0], sizes = [1, 8, 8], strides = [1, 1, 1]} : vector<4x8x8xf32> to vector<1x8x8xf32>
    %117 = vector.shape_cast %116 : vector<1x8x8xf32> to vector<8x8xf32>
    %c0_74 = arith.constant 0 : index
    %c0_75 = arith.constant 0 : index
    %118 = vector.load %arg11[%c0_74, %c0_75] : memref<8x32xf32, #tpu.memory_space<vmem>>, vector<8x8xf32>
    tpu.vector_store %arg11[%c0_74, %c0_75], %117 {strides = array<i32>} : memref<8x32xf32, #tpu.memory_space<vmem>>, vector<8x8xf32>,
    %119 = vector.extract_strided_slice %115 {offsets = [1, 0, 0], sizes = [1, 8, 8], strides = [1, 1, 1]} : vector<4x8x8xf32> to vector<1x8x8xf32>
    %120 = vector.shape_cast %119 : vector<1x8x8xf32> to vector<8x8xf32>
    %c0_76 = arith.constant 0 : index
    %c8_77 = arith.constant 8 : index
    %121 = vector.load %arg11[%c0_76, %c8_77] : memref<8x32xf32, #tpu.memory_space<vmem>>, vector<8x8xf32>
    tpu.vector_store %arg11[%c0_76, %c8_77], %120 {strides = array<i32>} : memref<8x32xf32, #tpu.memory_space<vmem>>, vector<8x8xf32>,
    %122 = vector.extract_strided_slice %115 {offsets = [2, 0, 0], sizes = [1, 8, 8], strides = [1, 1, 1]} : vector<4x8x8xf32> to vector<1x8x8xf32>
    %123 = vector.shape_cast %122 : vector<1x8x8xf32> to vector<8x8xf32>
    %c0_78 = arith.constant 0 : index
    %c16 = arith.constant 16 : index
    %124 = vector.load %arg11[%c0_78, %c16] : memref<8x32xf32, #tpu.memory_space<vmem>>, vector<8x8xf32>
    tpu.vector_store %arg11[%c0_78, %c16], %123 {strides = array<i32>} : memref<8x32xf32, #tpu.memory_space<vmem>>, vector<8x8xf32>,
    %125 = vector.extract_strided_slice %115 {offsets = [3, 0, 0], sizes = [1, 8, 8], strides = [1, 1, 1]} : vector<4x8x8xf32> to vector<1x8x8xf32>
    %126 = vector.shape_cast %125 : vector<1x8x8xf32> to vector<8x8xf32>
    %c0_79 = arith.constant 0 : index
    %c24 = arith.constant 24 : index
    %127 = vector.load %arg11[%c0_79, %c24] : memref<8x32xf32, #tpu.memory_space<vmem>>, vector<8x8xf32>
    tpu.vector_store %arg11[%c0_79, %c24], %126 {strides = array<i32>} : memref<8x32xf32, #tpu.memory_space<vmem>>, vector<8x8xf32>,
    %c0_80 = arith.constant 0 : index
    %c0_81 = arith.constant 0 : index
    %128 = vector.load %arg11[%c0_80, %c0_81] : memref<8x32xf32, #tpu.memory_space<vmem>>, vector<8x32xf32>
    %c0_82 = arith.constant 0 : index
    %c0_83 = arith.constant 0 : index
    %c0_84 = arith.constant 0 : index
    %129 = vector.load %arg6[%c0_82, %c0_83, %c0_84] : memref<2x32x32xf32, #tpu.memory_space<vmem>>, vector<1x32x32xf32>
    %130 = vector.shape_cast %129 : vector<1x32x32xf32> to vector<32x32xf32>
    %cst_85 = arith.constant dense<0.000000e+00> : vector<8x32xf32>
    %131 = tpu.matmul %128, %130, %cst_85 {dimension_numbers = #tpu.dot_dimension_numbers<[1], [0], [0], [1], [0, 0, 1, 1], [], []>} : vector<8x32xf32>, vector<32x32xf32>, vector<8x32xf32> -> vector<8x32xf32>
    %132 = arith.addf %5, %131 : vector<8x32xf32>
    %133 = vector.broadcast %21 : vector<1x32xf32> to vector<8x32xf32>
    %134 = arith.addf %132, %133 : vector<8x32xf32>
    %cst_86 = arith.constant dense<0.000000e+00> : vector<8xf32>
    %135 = vector.multi_reduction <add>, %134, %cst_86 [1] : vector<8x32xf32> to vector<8xf32>
    %136 = vector.shape_cast %135 : vector<8xf32> to vector<8x1xf32>
    %cst_87 = arith.constant 3.200000e+01 : f32
    %137 = vector.broadcast %cst_87 : f32 to vector<8x1xf32>
    %138 = arith.divf %136, %137 : vector<8x1xf32>
    %139 = vector.broadcast %138 : vector<8x1xf32> to vector<8x32xf32>
    %140 = arith.subf %134, %139 : vector<8x32xf32>
    %141 = arith.mulf %140, %140 : vector<8x32xf32>
    %cst_88 = arith.constant dense<0.000000e+00> : vector<8xf32>
    %142 = vector.multi_reduction <add>, %141, %cst_88 [1] : vector<8x32xf32> to vector<8xf32>
    %143 = vector.shape_cast %142 : vector<8xf32> to vector<8x1xf32>
    %cst_89 = arith.constant 3.200000e+01 : f32
    %144 = vector.broadcast %cst_89 : f32 to vector<8x1xf32>
    %145 = arith.divf %143, %144 : vector<8x1xf32>
    %cst_90 = arith.constant 9.99999996E-13 : f32
    %146 = vector.broadcast %cst_90 : f32 to vector<8x1xf32>
    %147 = arith.addf %145, %146 : vector<8x1xf32>
    %148 = math.rsqrt %147 : vector<8x1xf32>
    %149 = vector.broadcast %148 : vector<8x1xf32> to vector<8x32xf32>
    %150 = arith.mulf %140, %149 : vector<8x32xf32>
    %151 = vector.broadcast %18 : vector<1x32xf32> to vector<8x32xf32>
    %152 = arith.mulf %150, %151 : vector<8x32xf32>
    %153 = vector.broadcast %19 : vector<1x32xf32> to vector<8x32xf32>
    %154 = arith.addf %152, %153 : vector<8x32xf32>
    %c0_91 = arith.constant 0 : index
    %c0_92 = arith.constant 0 : index
    %c0_93 = arith.constant 0 : index
    %155 = vector.load %arg7[%c0_91, %c0_92, %c0_93] : memref<2x32x64xf32, #tpu.memory_space<vmem>>, vector<1x32x64xf32>
    %156 = vector.shape_cast %155 : vector<1x32x64xf32> to vector<32x64xf32>
    %cst_94 = arith.constant dense<0.000000e+00> : vector<8x64xf32>
    %157 = tpu.matmul %154, %156, %cst_94 {dimension_numbers = #tpu.dot_dimension_numbers<[1], [0], [0], [1], [0, 0, 1, 1], [], []>} : vector<8x32xf32>, vector<32x64xf32>, vector<8x64xf32> -> vector<8x64xf32>
    %158 = vector.broadcast %22 : vector<1x64xf32> to vector<8x64xf32>
    %159 = arith.addf %157, %158 : vector<8x64xf32>
    %cst_95 = arith.constant 0.000000e+00 : f32
    %160 = vector.broadcast %cst_95 : f32 to vector<8x64xf32>
    %161 = arith.maximumf %159, %160 : vector<8x64xf32>
    %c0_96 = arith.constant 0 : index
    %c0_97 = arith.constant 0 : index
    %c0_98 = arith.constant 0 : index
    %162 = vector.load %arg8[%c0_96, %c0_97, %c0_98] : memref<2x64x32xf32, #tpu.memory_space<vmem>>, vector<1x64x32xf32>
    %163 = vector.shape_cast %162 : vector<1x64x32xf32> to vector<64x32xf32>
    %cst_99 = arith.constant dense<0.000000e+00> : vector<8x32xf32>
    %164 = tpu.matmul %161, %163, %cst_99 {dimension_numbers = #tpu.dot_dimension_numbers<[1], [0], [0], [1], [0, 0, 1, 1], [], []>} : vector<8x64xf32>, vector<64x32xf32>, vector<8x32xf32> -> vector<8x32xf32>
    %165 = arith.addf %134, %164 : vector<8x32xf32>
    %166 = vector.broadcast %23 : vector<1x32xf32> to vector<8x32xf32>
    %167 = arith.addf %165, %166 : vector<8x32xf32>
    %c8_100 = arith.constant 8 : index
    %c0_101 = arith.constant 0 : index
    %168 = vector.load %arg4[%c8_100, %c0_101] : memref<24x128xf32, #tpu.memory_space<vmem>>, vector<1x32xf32>
    %c9_102 = arith.constant 9 : index
    %c0_103 = arith.constant 0 : index
    %169 = vector.load %arg4[%c9_102, %c0_103] : memref<24x128xf32, #tpu.memory_space<vmem>>, vector<1x32xf32>
    %c10_104 = arith.constant 10 : index
    %c0_105 = arith.constant 0 : index
    %170 = vector.load %arg4[%c10_104, %c0_105] : memref<24x128xf32, #tpu.memory_space<vmem>>, vector<1x32xf32>
    %c11_106 = arith.constant 11 : index
    %c0_107 = arith.constant 0 : index
    %171 = vector.load %arg4[%c11_106, %c0_107] : memref<24x128xf32, #tpu.memory_space<vmem>>, vector<1x32xf32>
    %c12 = arith.constant 12 : index
    %c0_108 = arith.constant 0 : index
    %172 = vector.load %arg4[%c12, %c0_108] : memref<24x128xf32, #tpu.memory_space<vmem>>, vector<1x96xf32>
    %c13 = arith.constant 13 : index
    %c0_109 = arith.constant 0 : index
    %173 = vector.load %arg4[%c13, %c0_109] : memref<24x128xf32, #tpu.memory_space<vmem>>, vector<1x32xf32>
    %c14 = arith.constant 14 : index
    %c0_110 = arith.constant 0 : index
    %174 = vector.load %arg4[%c14, %c0_110] : memref<24x128xf32, #tpu.memory_space<vmem>>, vector<1x64xf32>
    %c15 = arith.constant 15 : index
    %c0_111 = arith.constant 0 : index
    %175 = vector.load %arg4[%c15, %c0_111] : memref<24x128xf32, #tpu.memory_space<vmem>>, vector<1x32xf32>
    %cst_112 = arith.constant dense<0.000000e+00> : vector<8xf32>
    %176 = vector.multi_reduction <add>, %167, %cst_112 [1] : vector<8x32xf32> to vector<8xf32>
    %177 = vector.shape_cast %176 : vector<8xf32> to vector<8x1xf32>
    %cst_113 = arith.constant 3.200000e+01 : f32
    %178 = vector.broadcast %cst_113 : f32 to vector<8x1xf32>
    %179 = arith.divf %177, %178 : vector<8x1xf32>
    %180 = vector.broadcast %179 : vector<8x1xf32> to vector<8x32xf32>
    %181 = arith.subf %167, %180 : vector<8x32xf32>
    %182 = arith.mulf %181, %181 : vector<8x32xf32>
    %cst_114 = arith.constant dense<0.000000e+00> : vector<8xf32>
    %183 = vector.multi_reduction <add>, %182, %cst_114 [1] : vector<8x32xf32> to vector<8xf32>
    %184 = vector.shape_cast %183 : vector<8xf32> to vector<8x1xf32>
    %cst_115 = arith.constant 3.200000e+01 : f32
    %185 = vector.broadcast %cst_115 : f32 to vector<8x1xf32>
    %186 = arith.divf %184, %185 : vector<8x1xf32>
    %cst_116 = arith.constant 9.99999996E-13 : f32
    %187 = vector.broadcast %cst_116 : f32 to vector<8x1xf32>
    %188 = arith.addf %186, %187 : vector<8x1xf32>
    %189 = math.rsqrt %188 : vector<8x1xf32>
    %190 = vector.broadcast %189 : vector<8x1xf32> to vector<8x32xf32>
    %191 = arith.mulf %181, %190 : vector<8x32xf32>
    %192 = vector.broadcast %168 : vector<1x32xf32> to vector<8x32xf32>
    %193 = arith.mulf %191, %192 : vector<8x32xf32>
    %194 = vector.broadcast %169 : vector<1x32xf32> to vector<8x32xf32>
    %195 = arith.addf %193, %194 : vector<8x32xf32>
    %c1_117 = arith.constant 1 : index
    %c0_118 = arith.constant 0 : index
    %c0_119 = arith.constant 0 : index
    %196 = vector.load %arg5[%c1_117, %c0_118, %c0_119] : memref<2x32x96xf32, #tpu.memory_space<vmem>>, vector<1x32x96xf32>
    %197 = vector.shape_cast %196 : vector<1x32x96xf32> to vector<32x96xf32>
    %cst_120 = arith.constant dense<0.000000e+00> : vector<8x96xf32>
    %198 = tpu.matmul %195, %197, %cst_120 {dimension_numbers = #tpu.dot_dimension_numbers<[1], [0], [0], [1], [0, 0, 1, 1], [], []>} : vector<8x32xf32>, vector<32x96xf32>, vector<8x96xf32> -> vector<8x96xf32>
    %199 = vector.broadcast %172 : vector<1x96xf32> to vector<8x96xf32>
    %200 = arith.addf %198, %199 : vector<8x96xf32>
    %201 = vector.extract_strided_slice %200 {offsets = [0, 0], sizes = [8, 8], strides = [1, 1]} : vector<8x96xf32> to vector<8x8xf32>
    %c0_121 = arith.constant 0 : index
    %c0_122 = arith.constant 0 : index
    %c0_123 = arith.constant 0 : index
    %202 = vector.load %arg10[%c0_121, %c0_122, %c0_123] : memref<12x8x8xf32, #tpu.memory_space<vmem>>, vector<1x8x8xf32>
    %203 = vector.shape_cast %202 : vector<1x8x8xf32> to vector<8x8xf32>
    %204 = vector.shape_cast %201 : vector<8x8xf32> to vector<1x8x8xf32>
    tpu.vector_store %arg10[%c0_121, %c0_122, %c0_123], %204 {strides = array<i32>} : memref<12x8x8xf32, #tpu.memory_space<vmem>>, vector<1x8x8xf32>,
    %205 = vector.extract_strided_slice %200 {offsets = [0, 8], sizes = [8, 8], strides = [1, 1]} : vector<8x96xf32> to vector<8x8xf32>
    %c1_124 = arith.constant 1 : index
    %c0_125 = arith.constant 0 : index
    %c0_126 = arith.constant 0 : index
    %206 = vector.load %arg10[%c1_124, %c0_125, %c0_126] : memref<12x8x8xf32, #tpu.memory_space<vmem>>, vector<1x8x8xf32>
    %207 = vector.shape_cast %206 : vector<1x8x8xf32> to vector<8x8xf32>
    %208 = vector.shape_cast %205 : vector<8x8xf32> to vector<1x8x8xf32>
    tpu.vector_store %arg10[%c1_124, %c0_125, %c0_126], %208 {strides = array<i32>} : memref<12x8x8xf32, #tpu.memory_space<vmem>>, vector<1x8x8xf32>,
    %209 = vector.extract_strided_slice %200 {offsets = [0, 16], sizes = [8, 8], strides = [1, 1]} : vector<8x96xf32> to vector<8x8xf32>
    %c2_127 = arith.constant 2 : index
    %c0_128 = arith.constant 0 : index
    %c0_129 = arith.constant 0 : index
    %210 = vector.load %arg10[%c2_127, %c0_128, %c0_129] : memref<12x8x8xf32, #tpu.memory_space<vmem>>, vector<1x8x8xf32>
    %211 = vector.shape_cast %210 : vector<1x8x8xf32> to vector<8x8xf32>
    %212 = vector.shape_cast %209 : vector<8x8xf32> to vector<1x8x8xf32>
    tpu.vector_store %arg10[%c2_127, %c0_128, %c0_129], %212 {strides = array<i32>} : memref<12x8x8xf32, #tpu.memory_space<vmem>>, vector<1x8x8xf32>,
    %213 = vector.extract_strided_slice %200 {offsets = [0, 24], sizes = [8, 8], strides = [1, 1]} : vector<8x96xf32> to vector<8x8xf32>
    %c3_130 = arith.constant 3 : index
    %c0_131 = arith.constant 0 : index
    %c0_132 = arith.constant 0 : index
    %214 = vector.load %arg10[%c3_130, %c0_131, %c0_132] : memref<12x8x8xf32, #tpu.memory_space<vmem>>, vector<1x8x8xf32>
    %215 = vector.shape_cast %214 : vector<1x8x8xf32> to vector<8x8xf32>
    %216 = vector.shape_cast %213 : vector<8x8xf32> to vector<1x8x8xf32>
    tpu.vector_store %arg10[%c3_130, %c0_131, %c0_132], %216 {strides = array<i32>} : memref<12x8x8xf32, #tpu.memory_space<vmem>>, vector<1x8x8xf32>,
    %217 = vector.extract_strided_slice %200 {offsets = [0, 32], sizes = [8, 8], strides = [1, 1]} : vector<8x96xf32> to vector<8x8xf32>
    %c4_133 = arith.constant 4 : index
    %c0_134 = arith.constant 0 : index
    %c0_135 = arith.constant 0 : index
    %218 = vector.load %arg10[%c4_133, %c0_134, %c0_135] : memref<12x8x8xf32, #tpu.memory_space<vmem>>, vector<1x8x8xf32>
    %219 = vector.shape_cast %218 : vector<1x8x8xf32> to vector<8x8xf32>
    %220 = vector.shape_cast %217 : vector<8x8xf32> to vector<1x8x8xf32>
    tpu.vector_store %arg10[%c4_133, %c0_134, %c0_135], %220 {strides = array<i32>} : memref<12x8x8xf32, #tpu.memory_space<vmem>>, vector<1x8x8xf32>,
    %221 = vector.extract_strided_slice %200 {offsets = [0, 40], sizes = [8, 8], strides = [1, 1]} : vector<8x96xf32> to vector<8x8xf32>
    %c5_136 = arith.constant 5 : index
    %c0_137 = arith.constant 0 : index
    %c0_138 = arith.constant 0 : index
    %222 = vector.load %arg10[%c5_136, %c0_137, %c0_138] : memref<12x8x8xf32, #tpu.memory_space<vmem>>, vector<1x8x8xf32>
    %223 = vector.shape_cast %222 : vector<1x8x8xf32> to vector<8x8xf32>
    %224 = vector.shape_cast %221 : vector<8x8xf32> to vector<1x8x8xf32>
    tpu.vector_store %arg10[%c5_136, %c0_137, %c0_138], %224 {strides = array<i32>} : memref<12x8x8xf32, #tpu.memory_space<vmem>>, vector<1x8x8xf32>,
    %225 = vector.extract_strided_slice %200 {offsets = [0, 48], sizes = [8, 8], strides = [1, 1]} : vector<8x96xf32> to vector<8x8xf32>
    %c6_139 = arith.constant 6 : index
    %c0_140 = arith.constant 0 : index
    %c0_141 = arith.constant 0 : index
    %226 = vector.load %arg10[%c6_139, %c0_140, %c0_141] : memref<12x8x8xf32, #tpu.memory_space<vmem>>, vector<1x8x8xf32>
    %227 = vector.shape_cast %226 : vector<1x8x8xf32> to vector<8x8xf32>
    %228 = vector.shape_cast %225 : vector<8x8xf32> to vector<1x8x8xf32>
    tpu.vector_store %arg10[%c6_139, %c0_140, %c0_141], %228 {strides = array<i32>} : memref<12x8x8xf32, #tpu.memory_space<vmem>>, vector<1x8x8xf32>,
    %229 = vector.extract_strided_slice %200 {offsets = [0, 56], sizes = [8, 8], strides = [1, 1]} : vector<8x96xf32> to vector<8x8xf32>
    %c7_142 = arith.constant 7 : index
    %c0_143 = arith.constant 0 : index
    %c0_144 = arith.constant 0 : index
    %230 = vector.load %arg10[%c7_142, %c0_143, %c0_144] : memref<12x8x8xf32, #tpu.memory_space<vmem>>, vector<1x8x8xf32>
    %231 = vector.shape_cast %230 : vector<1x8x8xf32> to vector<8x8xf32>
    %232 = vector.shape_cast %229 : vector<8x8xf32> to vector<1x8x8xf32>
    tpu.vector_store %arg10[%c7_142, %c0_143, %c0_144], %232 {strides = array<i32>} : memref<12x8x8xf32, #tpu.memory_space<vmem>>, vector<1x8x8xf32>,
    %233 = vector.extract_strided_slice %200 {offsets = [0, 64], sizes = [8, 8], strides = [1, 1]} : vector<8x96xf32> to vector<8x8xf32>
    %c8_145 = arith.constant 8 : index
    %c0_146 = arith.constant 0 : index
    %c0_147 = arith.constant 0 : index
    %234 = vector.load %arg10[%c8_145, %c0_146, %c0_147] : memref<12x8x8xf32, #tpu.memory_space<vmem>>, vector<1x8x8xf32>
    %235 = vector.shape_cast %234 : vector<1x8x8xf32> to vector<8x8xf32>
    %236 = vector.shape_cast %233 : vector<8x8xf32> to vector<1x8x8xf32>
    tpu.vector_store %arg10[%c8_145, %c0_146, %c0_147], %236 {strides = array<i32>} : memref<12x8x8xf32, #tpu.memory_space<vmem>>, vector<1x8x8xf32>,
    %237 = vector.extract_strided_slice %200 {offsets = [0, 72], sizes = [8, 8], strides = [1, 1]} : vector<8x96xf32> to vector<8x8xf32>
    %c9_148 = arith.constant 9 : index
    %c0_149 = arith.constant 0 : index
    %c0_150 = arith.constant 0 : index
    %238 = vector.load %arg10[%c9_148, %c0_149, %c0_150] : memref<12x8x8xf32, #tpu.memory_space<vmem>>, vector<1x8x8xf32>
    %239 = vector.shape_cast %238 : vector<1x8x8xf32> to vector<8x8xf32>
    %240 = vector.shape_cast %237 : vector<8x8xf32> to vector<1x8x8xf32>
    tpu.vector_store %arg10[%c9_148, %c0_149, %c0_150], %240 {strides = array<i32>} : memref<12x8x8xf32, #tpu.memory_space<vmem>>, vector<1x8x8xf32>,
    %241 = vector.extract_strided_slice %200 {offsets = [0, 80], sizes = [8, 8], strides = [1, 1]} : vector<8x96xf32> to vector<8x8xf32>
    %c10_151 = arith.constant 10 : index
    %c0_152 = arith.constant 0 : index
    %c0_153 = arith.constant 0 : index
    %242 = vector.load %arg10[%c10_151, %c0_152, %c0_153] : memref<12x8x8xf32, #tpu.memory_space<vmem>>, vector<1x8x8xf32>
    %243 = vector.shape_cast %242 : vector<1x8x8xf32> to vector<8x8xf32>
    %244 = vector.shape_cast %241 : vector<8x8xf32> to vector<1x8x8xf32>
    tpu.vector_store %arg10[%c10_151, %c0_152, %c0_153], %244 {strides = array<i32>} : memref<12x8x8xf32, #tpu.memory_space<vmem>>, vector<1x8x8xf32>,
    %245 = vector.extract_strided_slice %200 {offsets = [0, 88], sizes = [8, 8], strides = [1, 1]} : vector<8x96xf32> to vector<8x8xf32>
    %c11_154 = arith.constant 11 : index
    %c0_155 = arith.constant 0 : index
    %c0_156 = arith.constant 0 : index
    %246 = vector.load %arg10[%c11_154, %c0_155, %c0_156] : memref<12x8x8xf32, #tpu.memory_space<vmem>>, vector<1x8x8xf32>
    %247 = vector.shape_cast %246 : vector<1x8x8xf32> to vector<8x8xf32>
    %248 = vector.shape_cast %245 : vector<8x8xf32> to vector<1x8x8xf32>
    tpu.vector_store %arg10[%c11_154, %c0_155, %c0_156], %248 {strides = array<i32>} : memref<12x8x8xf32, #tpu.memory_space<vmem>>, vector<1x8x8xf32>,
    %c0_157 = arith.constant 0 : index
    %c0_158 = arith.constant 0 : index
    %c0_159 = arith.constant 0 : index
    %249 = vector.load %arg10[%c0_157, %c0_158, %c0_159] : memref<12x8x8xf32, #tpu.memory_space<vmem>>, vector<4x8x8xf32>
    %c4_160 = arith.constant 4 : index
    %c0_161 = arith.constant 0 : index
    %c0_162 = arith.constant 0 : index
    %250 = vector.load %arg10[%c4_160, %c0_161, %c0_162] : memref<12x8x8xf32, #tpu.memory_space<vmem>>, vector<4x8x8xf32>
    %c8_163 = arith.constant 8 : index
    %c0_164 = arith.constant 0 : index
    %c0_165 = arith.constant 0 : index
    %251 = vector.load %arg10[%c8_163, %c0_164, %c0_165] : memref<12x8x8xf32, #tpu.memory_space<vmem>>, vector<4x8x8xf32>
    "tpu.trace_start"() <{level = 10 : i32, message = "hqd,hkd->hqk"}> : () -> ()
    %cst_166 = arith.constant dense<0.000000e+00> : vector<4x8x8xf32>
    %252 = tpu.matmul %249, %250, %cst_166 {dimension_numbers = #tpu.dot_dimension_numbers<[2], [2], [1], [1], [0, 0, 0, 1, 1, 1], [0], [0]>} : vector<4x8x8xf32>, vector<4x8x8xf32>, vector<4x8x8xf32> -> vector<4x8x8xf32>
    "tpu.trace_stop"() : () -> ()
    %253 = vector.broadcast %11 : vector<1x1x8xf32> to vector<4x8x8xf32>
    %254 = arith.addf %252, %253 : vector<4x8x8xf32>
    %cst_167 = arith.constant dense<0xFF800000> : vector<4x8xf32>
    %255 = vector.multi_reduction <maximumf>, %254, %cst_167 [2] : vector<4x8x8xf32> to vector<4x8xf32>
    %256 = vector.shape_cast %255 : vector<4x8xf32> to vector<4x8x1xf32>
    %257 = vector.broadcast %256 : vector<4x8x1xf32> to vector<4x8x8xf32>
    %258 = arith.subf %254, %257 : vector<4x8x8xf32>
    %259 = math.exp %258 : vector<4x8x8xf32>
    %cst_168 = arith.constant dense<0.000000e+00> : vector<4x8xf32>
    %260 = vector.multi_reduction <add>, %259, %cst_168 [2] : vector<4x8x8xf32> to vector<4x8xf32>
    %261 = vector.shape_cast %260 : vector<4x8xf32> to vector<4x8x1xf32>
    %262 = tpu.reciprocal %261 {approx = true} : vector<4x8x1xf32> -> vector<4x8x1xf32>
    %263 = vector.broadcast %262 : vector<4x8x1xf32> to vector<4x8x8xf32>
    %264 = arith.mulf %259, %263 : vector<4x8x8xf32>
    %265 = vector.broadcast %15 : vector<1x1x8xf32> to vector<4x8x8xf32>
    %266 = arith.mulf %264, %265 : vector<4x8x8xf32>
    "tpu.trace_start"() <{level = 10 : i32, message = "hqk,hkd->hqd"}> : () -> ()
    %cst_169 = arith.constant dense<0.000000e+00> : vector<4x8x8xf32>
    %267 = tpu.matmul %266, %251, %cst_169 {dimension_numbers = #tpu.dot_dimension_numbers<[2], [1], [1], [2], [0, 0, 0, 1, 1, 2], [0], [0]>} : vector<4x8x8xf32>, vector<4x8x8xf32>, vector<4x8x8xf32> -> vector<4x8x8xf32>
    "tpu.trace_stop"() : () -> ()
    %268 = vector.extract_strided_slice %267 {offsets = [0, 0, 0], sizes = [1, 8, 8], strides = [1, 1, 1]} : vector<4x8x8xf32> to vector<1x8x8xf32>
    %269 = vector.shape_cast %268 : vector<1x8x8xf32> to vector<8x8xf32>
    %c0_170 = arith.constant 0 : index
    %c0_171 = arith.constant 0 : index
    %270 = vector.load %arg11[%c0_170, %c0_171] : memref<8x32xf32, #tpu.memory_space<vmem>>, vector<8x8xf32>
    tpu.vector_store %arg11[%c0_170, %c0_171], %269 {strides = array<i32>} : memref<8x32xf32, #tpu.memory_space<vmem>>, vector<8x8xf32>,
    %271 = vector.extract_strided_slice %267 {offsets = [1, 0, 0], sizes = [1, 8, 8], strides = [1, 1, 1]} : vector<4x8x8xf32> to vector<1x8x8xf32>
    %272 = vector.shape_cast %271 : vector<1x8x8xf32> to vector<8x8xf32>
    %c0_172 = arith.constant 0 : index
    %c8_173 = arith.constant 8 : index
    %273 = vector.load %arg11[%c0_172, %c8_173] : memref<8x32xf32, #tpu.memory_space<vmem>>, vector<8x8xf32>
    tpu.vector_store %arg11[%c0_172, %c8_173], %272 {strides = array<i32>} : memref<8x32xf32, #tpu.memory_space<vmem>>, vector<8x8xf32>,
    %274 = vector.extract_strided_slice %267 {offsets = [2, 0, 0], sizes = [1, 8, 8], strides = [1, 1, 1]} : vector<4x8x8xf32> to vector<1x8x8xf32>
    %275 = vector.shape_cast %274 : vector<1x8x8xf32> to vector<8x8xf32>
    %c0_174 = arith.constant 0 : index
    %c16_175 = arith.constant 16 : index
    %276 = vector.load %arg11[%c0_174, %c16_175] : memref<8x32xf32, #tpu.memory_space<vmem>>, vector<8x8xf32>
    tpu.vector_store %arg11[%c0_174, %c16_175], %275 {strides = array<i32>} : memref<8x32xf32, #tpu.memory_space<vmem>>, vector<8x8xf32>,
    %277 = vector.extract_strided_slice %267 {offsets = [3, 0, 0], sizes = [1, 8, 8], strides = [1, 1, 1]} : vector<4x8x8xf32> to vector<1x8x8xf32>
    %278 = vector.shape_cast %277 : vector<1x8x8xf32> to vector<8x8xf32>
    %c0_176 = arith.constant 0 : index
    %c24_177 = arith.constant 24 : index
    %279 = vector.load %arg11[%c0_176, %c24_177] : memref<8x32xf32, #tpu.memory_space<vmem>>, vector<8x8xf32>
    tpu.vector_store %arg11[%c0_176, %c24_177], %278 {strides = array<i32>} : memref<8x32xf32, #tpu.memory_space<vmem>>, vector<8x8xf32>,
    %c0_178 = arith.constant 0 : index
    %c0_179 = arith.constant 0 : index
    %280 = vector.load %arg11[%c0_178, %c0_179] : memref<8x32xf32, #tpu.memory_space<vmem>>, vector<8x32xf32>
    %c1_180 = arith.constant 1 : index
    %c0_181 = arith.constant 0 : index
    %c0_182 = arith.constant 0 : index
    %281 = vector.load %arg6[%c1_180, %c0_181, %c0_182] : memref<2x32x32xf32, #tpu.memory_space<vmem>>, vector<1x32x32xf32>
    %282 = vector.shape_cast %281 : vector<1x32x32xf32> to vector<32x32xf32>
    %cst_183 = arith.constant dense<0.000000e+00> : vector<8x32xf32>
    %283 = tpu.matmul %280, %282, %cst_183 {dimension_numbers = #tpu.dot_dimension_numbers<[1], [0], [0], [1], [0, 0, 1, 1], [], []>} : vector<8x32xf32>, vector<32x32xf32>, vector<8x32xf32> -> vector<8x32xf32>
    %284 = arith.addf %167, %283 : vector<8x32xf32>
    %285 = vector.broadcast %173 : vector<1x32xf32> to vector<8x32xf32>
    %286 = arith.addf %284, %285 : vector<8x32xf32>
    %cst_184 = arith.constant dense<0.000000e+00> : vector<8xf32>
    %287 = vector.multi_reduction <add>, %286, %cst_184 [1] : vector<8x32xf32> to vector<8xf32>
    %288 = vector.shape_cast %287 : vector<8xf32> to vector<8x1xf32>
    %cst_185 = arith.constant 3.200000e+01 : f32
    %289 = vector.broadcast %cst_185 : f32 to vector<8x1xf32>
    %290 = arith.divf %288, %289 : vector<8x1xf32>
    %291 = vector.broadcast %290 : vector<8x1xf32> to vector<8x32xf32>
    %292 = arith.subf %286, %291 : vector<8x32xf32>
    %293 = arith.mulf %292, %292 : vector<8x32xf32>
    %cst_186 = arith.constant dense<0.000000e+00> : vector<8xf32>
    %294 = vector.multi_reduction <add>, %293, %cst_186 [1] : vector<8x32xf32> to vector<8xf32>
    %295 = vector.shape_cast %294 : vector<8xf32> to vector<8x1xf32>
    %cst_187 = arith.constant 3.200000e+01 : f32
    %296 = vector.broadcast %cst_187 : f32 to vector<8x1xf32>
    %297 = arith.divf %295, %296 : vector<8x1xf32>
    %cst_188 = arith.constant 9.99999996E-13 : f32
    %298 = vector.broadcast %cst_188 : f32 to vector<8x1xf32>
    %299 = arith.addf %297, %298 : vector<8x1xf32>
    %300 = math.rsqrt %299 : vector<8x1xf32>
    %301 = vector.broadcast %300 : vector<8x1xf32> to vector<8x32xf32>
    %302 = arith.mulf %292, %301 : vector<8x32xf32>
    %303 = vector.broadcast %170 : vector<1x32xf32> to vector<8x32xf32>
    %304 = arith.mulf %302, %303 : vector<8x32xf32>
    %305 = vector.broadcast %171 : vector<1x32xf32> to vector<8x32xf32>
    %306 = arith.addf %304, %305 : vector<8x32xf32>
    %c1_189 = arith.constant 1 : index
    %c0_190 = arith.constant 0 : index
    %c0_191 = arith.constant 0 : index
    %307 = vector.load %arg7[%c1_189, %c0_190, %c0_191] : memref<2x32x64xf32, #tpu.memory_space<vmem>>, vector<1x32x64xf32>
    %308 = vector.shape_cast %307 : vector<1x32x64xf32> to vector<32x64xf32>
    %cst_192 = arith.constant dense<0.000000e+00> : vector<8x64xf32>
    %309 = tpu.matmul %306, %308, %cst_192 {dimension_numbers = #tpu.dot_dimension_numbers<[1], [0], [0], [1], [0, 0, 1, 1], [], []>} : vector<8x32xf32>, vector<32x64xf32>, vector<8x64xf32> -> vector<8x64xf32>
    %310 = vector.broadcast %174 : vector<1x64xf32> to vector<8x64xf32>
    %311 = arith.addf %309, %310 : vector<8x64xf32>
    %cst_193 = arith.constant 0.000000e+00 : f32
    %312 = vector.broadcast %cst_193 : f32 to vector<8x64xf32>
    %313 = arith.maximumf %311, %312 : vector<8x64xf32>
    %c1_194 = arith.constant 1 : index
    %c0_195 = arith.constant 0 : index
    %c0_196 = arith.constant 0 : index
    %314 = vector.load %arg8[%c1_194, %c0_195, %c0_196] : memref<2x64x32xf32, #tpu.memory_space<vmem>>, vector<1x64x32xf32>
    %315 = vector.shape_cast %314 : vector<1x64x32xf32> to vector<64x32xf32>
    %cst_197 = arith.constant dense<0.000000e+00> : vector<8x32xf32>
    %316 = tpu.matmul %313, %315, %cst_197 {dimension_numbers = #tpu.dot_dimension_numbers<[1], [0], [0], [1], [0, 0, 1, 1], [], []>} : vector<8x64xf32>, vector<64x32xf32>, vector<8x32xf32> -> vector<8x32xf32>
    %317 = arith.addf %286, %316 : vector<8x32xf32>
    %318 = vector.broadcast %175 : vector<1x32xf32> to vector<8x32xf32>
    %319 = arith.addf %317, %318 : vector<8x32xf32>
    %c16_198 = arith.constant 16 : index
    %c0_199 = arith.constant 0 : index
    %320 = vector.load %arg4[%c16_198, %c0_199] : memref<24x128xf32, #tpu.memory_space<vmem>>, vector<1x32xf32>
    %c17 = arith.constant 17 : index
    %c0_200 = arith.constant 0 : index
    %321 = vector.load %arg4[%c17, %c0_200] : memref<24x128xf32, #tpu.memory_space<vmem>>, vector<1x32xf32>
    %cst_201 = arith.constant dense<0.000000e+00> : vector<8xf32>
    %322 = vector.multi_reduction <add>, %319, %cst_201 [1] : vector<8x32xf32> to vector<8xf32>
    %323 = vector.shape_cast %322 : vector<8xf32> to vector<8x1xf32>
    %cst_202 = arith.constant 3.200000e+01 : f32
    %324 = vector.broadcast %cst_202 : f32 to vector<8x1xf32>
    %325 = arith.divf %323, %324 : vector<8x1xf32>
    %326 = vector.broadcast %325 : vector<8x1xf32> to vector<8x32xf32>
    %327 = arith.subf %319, %326 : vector<8x32xf32>
    %328 = arith.mulf %327, %327 : vector<8x32xf32>
    %cst_203 = arith.constant dense<0.000000e+00> : vector<8xf32>
    %329 = vector.multi_reduction <add>, %328, %cst_203 [1] : vector<8x32xf32> to vector<8xf32>
    %330 = vector.shape_cast %329 : vector<8xf32> to vector<8x1xf32>
    %cst_204 = arith.constant 3.200000e+01 : f32
    %331 = vector.broadcast %cst_204 : f32 to vector<8x1xf32>
    %332 = arith.divf %330, %331 : vector<8x1xf32>
    %cst_205 = arith.constant 9.99999996E-13 : f32
    %333 = vector.broadcast %cst_205 : f32 to vector<8x1xf32>
    %334 = arith.addf %332, %333 : vector<8x1xf32>
    %335 = math.rsqrt %334 : vector<8x1xf32>
    %336 = vector.broadcast %335 : vector<8x1xf32> to vector<8x32xf32>
    %337 = arith.mulf %327, %336 : vector<8x32xf32>
    %338 = vector.broadcast %320 : vector<1x32xf32> to vector<8x32xf32>
    %339 = arith.mulf %337, %338 : vector<8x32xf32>
    %340 = vector.broadcast %321 : vector<1x32xf32> to vector<8x32xf32>
    %341 = arith.addf %339, %340 : vector<8x32xf32>
    %342 = vector.shape_cast %341 : vector<8x32xf32> to vector<1x8x32xf32>
    %c0_206 = arith.constant 0 : index
    %c0_207 = arith.constant 0 : index
    %c0_208 = arith.constant 0 : index
    %343 = vector.load %arg9[%c0_206, %c0_207, %c0_208] : memref<1x8x32xf32, #tpu.memory_space<vmem>>, vector<1x8x32xf32>
    tpu.vector_store %arg9[%c0_206, %c0_207, %c0_208], %342 {strides = array<i32>} : memref<1x8x32xf32, #tpu.memory_space<vmem>>, vector<1x8x32xf32>,
    return
  }
  func.func @transform_0(%arg0: i32) -> (i32, i32, i32) {
    %c0_i32 = arith.constant 0 : i32
    %c0_i32_0 = arith.constant 0 : i32
    %c0_i32_1 = arith.constant 0 : i32
    return %arg0, %c0_i32, %c0_i32_0 : i32, i32, i32
  }
  func.func @transform_1(%arg0: i32) -> (i32, i32, i32) {
    %c0_i32 = arith.constant 0 : i32
    %c0_i32_0 = arith.constant 0 : i32
    %c0_i32_1 = arith.constant 0 : i32
    return %arg0, %c0_i32, %c0_i32_0 : i32, i32, i32
  }
  func.func @transform_2(%arg0: i32) -> (i32, i32) {
    %c0_i32 = arith.constant 0 : i32
    %c0_i32_0 = arith.constant 0 : i32
    %c0_i32_1 = arith.constant 0 : i32
    return %c0_i32, %c0_i32_0 : i32, i32
  }
  func.func @transform_3(%arg0: i32) -> (i32, i32) {
    %c0_i32 = arith.constant 0 : i32
    %c0_i32_0 = arith.constant 0 : i32
    %c0_i32_1 = arith.constant 0 : i32
    return %c0_i32, %c0_i32_0 : i32, i32
  }
  func.func @transform_4(%arg0: i32) -> (i32, i32, i32) {
    %c0_i32 = arith.constant 0 : i32
    %c0_i32_0 = arith.constant 0 : i32
    %c0_i32_1 = arith.constant 0 : i32
    %c0_i32_2 = arith.constant 0 : i32
    return %c0_i32, %c0_i32_0, %c0_i32_1 : i32, i32, i32
  }
  func.func @transform_5(%arg0: i32) -> (i32, i32, i32) {
    %c0_i32 = arith.constant 0 : i32
    %c0_i32_0 = arith.constant 0 : i32
    %c0_i32_1 = arith.constant 0 : i32
    %c0_i32_2 = arith.constant 0 : i32
    return %c0_i32, %c0_i32_0, %c0_i32_1 : i32, i32, i32
  }
  func.func @transform_6(%arg0: i32) -> (i32, i32, i32) {
    %c0_i32 = arith.constant 0 : i32
    %c0_i32_0 = arith.constant 0 : i32
    %c0_i32_1 = arith.constant 0 : i32
    %c0_i32_2 = arith.constant 0 : i32
    return %c0_i32, %c0_i32_0, %c0_i32_1 : i32, i32, i32
  }
  func.func @transform_7(%arg0: i32) -> (i32, i32, i32) {
    %c0_i32 = arith.constant 0 : i32
    %c0_i32_0 = arith.constant 0 : i32
    %c0_i32_1 = arith.constant 0 : i32
    %c0_i32_2 = arith.constant 0 : i32
    return %c0_i32, %c0_i32_0, %c0_i32_1 : i32, i32, i32
  }
  func.func @transform_8(%arg0: i32) -> (i32, i32, i32) {
    %c0_i32 = arith.constant 0 : i32
    %c0_i32_0 = arith.constant 0 : i32
    %c0_i32_1 = arith.constant 0 : i32
    return %arg0, %c0_i32, %c0_i32_0 : i32, i32, i32
  }
}

</mosaic_0001>

<bundles_post_ra>
// kernel: tpu_custom_call.1
= control target key start
LH: loop header
LB: loop body
LE: loop exit
PB: predicated region body
PF: predicated region fallthrough
CT: control target
= control target key end

     0   :  { %s4166_s0 = inlined_call_operand.hbm [shape: f32[2,8,32], index: 0, kind: input, shape index: {}]   ;;  %s4167_s1 = inlined_call_operand.hbm [shape: f32[2,1,8], index: 1, kind: input, shape index: {}]   ;;  %s4168_s2 = inlined_call_operand.hbm [shape: f32[8,32], index: 2, kind: input, shape index: {}]   ;;  %s4169_s3 = inlined_call_operand.hbm [shape: f32[24,128], index: 3, kind: input, shape index: {}]   ;;  %s4170_s4 = inlined_call_operand.vmem [shape: f32[2,32,96], index: 4, kind: input, shape index: {}]   ;;  %s4171_s5 = inlined_call_operand.vmem [shape: f32[2,32,32], index: 5, kind: input, shape index: {}]   ;;  %s4172_s6 = inlined_call_operand.vmem [shape: f32[2,32,64], index: 6, kind: input, shape index: {}]   ;;  %s4173_s7 = inlined_call_operand.vmem [shape: f32[2,64,32], index: 7, kind: input, shape index: {}]   ;;  %s4174_s8 = inlined_call_operand.hbm [shape: f32[2,8,32], index: 8, kind: output, shape index: {}]  }
   0x1   :  { %4186 = sst [smem:[#allocation20_spill]] %s4166_s0 }
   0x2   :  { %4187 = sst [smem:[#allocation21_spill]] %s4168_s2 }
   0x3   :  { %4188 = sst [smem:[#allocation22_spill]] %s4169_s3 }
   0x4   :  { %13 = vsyncpa [#allocation5], 0 }
   0x5   :  { %15 = vsyncpa [#allocation5 + $0x1], 0 }
   0x6   :  { %16 = vsyncpa [#allocation8], 0 }
   0x7   :  { %18 = vsyncpa [#allocation8 + $0x1], 0 }
   0x8   :  { %19 = vsyncpa [#allocation11], 0 }
   0x9   :  { %20 = vsyncpa [#allocation6], 0 }
   0xa   :  { %22 = vsyncpa [#allocation6 + $0x1], 0  ;;  %s3526_s27 = smov 0   ;;  %s3528_s28 = smov 0  }
   0xb   :  { %s3530_s29 = smov 0   ;;  %s3532_s30 = smov 0  }
   0xc LB: > { %4189 = sst [smem:[#allocation18_spill]] %s3451_s29  ;;  %s3547_s9 = sadd.s32 4294967295, %s3455_s30   ;;  %s3455_s30 = sphi %s3532_s30, %s4221_s30   ;;  %s3451_s29 = sphi %s3530_s29, %s4218_s29   ;;  %s3447_s28 = sphi %s3528_s28, %s4220_s28   ;;  %s3443_s27 = sphi %s3526_s27, %s4219_s27  }
   0xd   : > { %s2786_s10 = sadd.s32 4294967294, %s3455_s30   ;;  %p48_p0 = scmp.ne.s32.totalorder %s3447_s28, %s3443_s27 }
   0xe   : > { %p4175_p1 = scmp.eq.s32.totalorder %s3547_s9, 0  ;;  %p230_p3 = scmp.eq.s32.totalorder %s2786_s10, 1 }
   0xf   : > { %p2787_p5 = scmp.ge.s32.totalorder %s3455_s30, 1  ;;  %p237_p7 = scmp.lt.s32.totalorder %s3455_s30, 3 }
  0x10   : > { %p3556_p4 = por %p4175_p1, %p48_p0  ;;  %p3561_p6 = por %p230_p3, %p48_p0 }
  0x11   : > { %p3566_p8 = pnand %p2787_p5, %p237_p7  ;;  %s3457_s14 = smov [#allocation9]  }
  0x12   : > { %s4190_s11 = scalar_select %p3556_p4, 1, 0 }
  0x13   : > { %s4191_s12 = scalar_select %p3561_p6, 1, 0 }
  0x14   : > { %s4192_s13 = scalar_select %p3566_p8, 1, 0 }
  0x15   : > { %s250_s15 = sshll.u32 %s3457_s14, 4  ;;  %p3152_p10 = pneg %p3566_p8  ;;  %s251_s15 = int_to_ptr.vmem [resolvable:$true] %s250_s15 }
  0x16   : > { %s3458_s16 = smov [#allocation10]   ;;  %s3282_s19 = scalar_lea.vmem %s251_s15, 128 }
  0x17   : > { %s260_s17 = sshll.u32 %s3458_s16, 4  ;;  %p3575_p11 = pnand %p3152_p10, %p4175_p1  ;;  %s261_s17 = int_to_ptr.vmem [resolvable:$true] %s260_s17 }
  0x18   : > { %p3283_p13 = scmp.ne.s32.totalorder %s251_s15, %s3282_s19  ;;  %p3290_p5 = scmp.lt.s32.totalorder %s251_s15, %s251_s15 }
  0x19   : > { %p3273_p12 = pneg %p3575_p11  ;;  %p3291_p7 = scmp.lt.s32.totalorder %s3282_s19, %s3282_s19 }
  0x1b   : > { %p3285_p0 = pnand %p3283_p13, %p3273_p12  ;;  %p3292_p9 = por %p3291_p7, %p3290_p5 }
  0x1d   : > { %p3286_p3 = pneg %p3285_p0 }
  0x1f   : > { %p3293_p2 = pnand %p3292_p9, %p3286_p3 }
  0x21   : > { %3296 = shalt.err (!%p3293_p2)
}
  0x22   : > { %s4194_s2 = sld [smem:[#allocation21_spill]]  ;;  %s3308_s22 = scalar_lea.vmem %s261_s17, 384 }
  0x23   : > { %p3309_p10 = scmp.ne.s32.totalorder %s261_s17, %s3308_s22  ;;  %p3316_p13 = scmp.lt.s32.totalorder %s261_s17, %s261_s17 }
  0x24   : > { %p3317_p0 = scmp.lt.s32.totalorder %s3308_s22, %s3308_s22 }
  0x25   : > { %p3311_p1 = pnand %p3309_p10, %p3273_p12 }
  0x26   : > { %p3318_p4 = por %p3317_p0, %p3316_p13 }
  0x27   : > { %p3312_p6 = pneg %p3311_p1 }
  0x28   : > { %3155 = dma.hbm_to_vmem [thread:$0]  (!%p3575_p11), %s4194_s2, 128, %s251_s15, [#allocation8]  }
  0x29   : > { %p3319_p8 = pnand %p3318_p4, %p3312_p6 }
  0x2b   : > { %3322 = shalt.err (!%p3319_p8)
}
  0x2c   : > { %s3459_s23 = smov 128   ;;  %s3460_s24 = smov 8  }
  0x2d   : > { %s4195_s3 = sld [smem:[#allocation22_spill]]  ;;  %s3598_s10 = sadd.s32 1, %s3455_s30  }
  0x2e   : > { %s35_s14 = sadd.s32 1, %s3451_s29  ;;  %s32_s15 = ssub.s32 %s3455_s30, %s3598_s10 }
  0x2f   : > { %p42_p1 = scmp.ne.s32.totalorder %s3451_s29, %s3447_s28  ;;  %p33_p2 = scmp.eq.s32.totalorder %s32_s15, 0 }
  0x30   : > { %p43_p4 = scmp.eq.s32.totalorder %s3455_s30, 0  ;;  %p4196_p6 = scmp.eq.s32.totalorder %s3547_s9, 1 }
  0x31   : > { %p3172_p9 = scmp.lt.s32.totalorder %s3455_s30, 2  ;;  %s3617_s19 = sand.u32 1, %s3451_s29  }
  0x32   : > { %p3608_p8 = por %p4196_p6, %p42_p1  ;;  %p44_p12 = por %p43_p4, %p42_p1 }
  0x33   : > { %3158 = dma.hbm_to_vmem [thread:$0]  (!%p3575_p11), %s4195_s3, 384, %s261_s17, [#allocation11], %s3459_s23, %s3459_s23, %s3460_s24  }
  0x34   : > { %s4197_s16 = scalar_select %p3608_p8, 1, 0 }
  0x35   : > { %s3614_s18 = scalar_select %p33_p2, %s3451_s29, %s35_s14  }
  0x36   : > { %s2791_s17 = sshll.u32 %s3617_s19, 3  ;;  %s2792_s20 = sshll.u32 %s3455_s30, 7 }
  0x37   : > { %4198 = sst [smem:[#allocation19_spill]] %s3614_s18  ;;  %s290_s24 = scalar_lea.vmem [#allocation4], %s2791_s17 }
  0x38   : > { %s4199_s0 = sld [smem:[#allocation20_spill]]  ;;  %s297_s25 = sshll.u32 %s290_s24, 4  ;;  %s3626_s25 = int_to_ptr.vmem [resolvable:$true] %s297_s25 }
  0x39   : > { %p3628_p11 = pnand %p3172_p9, %p44_p12  ;;  %s287_s15 = scalar_lea.sflag [#allocation5], %s3617_s19 }
  0x3b   : > { %p3325_p5 = pneg %p3628_p11 }
  0x3e   : > { %s3624_s23 = scalar_lea.hbm %s4199_s0, %s2792_s20  ;;  %s3328_s21 = scalar_lea.hbm %s4199_s0, 256 }
  0x3f   : > { %s3323_s2 = scalar_lea.hbm %s3624_s23, 128  ;;  %p3329_p13 = scmp.lt.s32.totalorder %s3624_s23, %s4199_s0 }
  0x40   : > { %p3324_p3 = scmp.ne.s32.totalorder %s3624_s23, %s3323_s2  ;;  %p3330_p0 = scmp.lt.s32.totalorder %s3328_s21, %s3323_s2 }
  0x42   : > { %p3326_p7 = pnand %p3325_p5, %p3324_p3  ;;  %p3331_p1 = por %p3330_p0, %p3329_p13 }
  0x44   : > { %p3327_p10 = pneg %p3326_p7 }
  0x46   : > { %p3332_p2 = pnand %p3331_p1, %p3327_p10 }
  0x48   : > { %3335 = shalt.err (!%p3332_p2)
}
  0x49   : > { %s3336_s14 = scalar_lea.vmem %s3626_s25, 128  ;;  %s3461_s17 = smov [#allocation4]  }
  0x4a   : > { %p3337_p4 = scmp.ne.s32.totalorder %s3626_s25, %s3336_s14  ;;  %s3341_s20 = sshll.u32 %s3461_s17, 4  ;;  %s3342_s20 = int_to_ptr.vmem [resolvable:$false] %s3341_s20 }
  0x4b   : > { %s3343_s3 = scalar_lea.vmem %s3342_s20, 256  ;;  %p3344_p12 = scmp.lt.s32.totalorder %s3626_s25, %s3342_s20 }
  0x4c   : > { %p3339_p6 = pnand %p3337_p4, %p3325_p5  ;;  %p3345_p3 = scmp.lt.s32.totalorder %s3343_s3, %s3336_s14 }
  0x4e   : > { %p3340_p9 = pneg %p3339_p6  ;;  %p3346_p7 = por %p3345_p3, %p3344_p12 }
  0x50   : > { %p3347_p13 = pnand %p3346_p7, %p3340_p9 }
  0x52   : > { %3350 = shalt.err (!%p3347_p13)
}
  0x53   : > { %3162 = dma.hbm_to_vmem [thread:$0]  (!%p3628_p11), %s3624_s23, 128, %s3626_s25, %s287_s15  }
  0x54   : > { %s2793_s2 = sshll.u32 %s3455_s30, 4  ;;  %s307_s21 = scalar_lea.vmem [#allocation7], %s3617_s19 }
  0x55   : > { %s314_s22 = sshll.u32 %s307_s21, 4  ;;  %s312_s20 = scalar_lea.hbm %s4167_s1, %s2793_s2  ;;  %s315_s22 = int_to_ptr.vmem [resolvable:$true] %s314_s22 }
  0x56   : > { %s4201_s3 = sand.u32 1, %s3455_s30   ;;  %s3351_s0 = scalar_lea.hbm %s312_s20, 16 }
  0x57   : > { %s305_s14 = scalar_lea.sflag [#allocation8], %s4201_s3  ;;  %p3352_p10 = scmp.ne.s32.totalorder %s312_s20, %s3351_s0 }
  0x58   : > { %s3356_s23 = scalar_lea.hbm %s4167_s1, 32  ;;  %p3357_p2 = scmp.lt.s32.totalorder %s312_s20, %s4167_s1 }
  0x59   : > { %p3354_p0 = pnand %p3352_p10, %p3325_p5  ;;  %p3358_p4 = scmp.lt.s32.totalorder %s3356_s23, %s3351_s0 }
  0x5b   : > { %p3355_p1 = pneg %p3354_p0  ;;  %p3359_p6 = por %p3358_p4, %p3357_p2 }
  0x5d   : > { %p3360_p9 = pnand %p3359_p6, %p3355_p1 }
  0x5f   : > { %3363 = shalt.err (!%p3360_p9)
}
  0x60   : > { %s3364_s15 = scalar_lea.vmem %s315_s22, 16  ;;  %s3462_s2 = smov [#allocation7]  }
  0x61   : > { %p3365_p12 = scmp.ne.s32.totalorder %s315_s22, %s3364_s15  ;;  %s3369_s21 = sshll.u32 %s3462_s2, 4  ;;  %s3370_s21 = int_to_ptr.vmem [resolvable:$false] %s3369_s21 }
  0x62   : > { %s3371_s29 = scalar_lea.vmem %s3370_s21, 32  ;;  %p3372_p13 = scmp.lt.s32.totalorder %s315_s22, %s3370_s21 }
  0x63   : > { %p3367_p3 = pnand %p3365_p12, %p3325_p5  ;;  %p3373_p10 = scmp.lt.s32.totalorder %s3371_s29, %s3364_s15 }
  0x65   : > { %p3368_p7 = pneg %p3367_p3  ;;  %p3374_p0 = por %p3373_p10, %p3372_p13 }
  0x67   : > { %p3375_p8 = pnand %p3374_p0, %p3368_p7 }
  0x69   : > { %3378 = shalt.err (!%p3375_p8)
}
  0x6a   : > { %3165 = dma.hbm_to_vmem [thread:$0]  (!%p3628_p11), %s312_s20, 16, %s315_s22, %s305_s14  }
  0x6b   : > { %p4202_p1 = scmp.ne.s32.totalorder %s4192_s13, 0 }
  0x6c   : > { %s3682_s0 = sand.u32 (!%p4202_p1), 1, %s3447_s28   ;;  %p4203_p5 = scmp.ne.s32.totalorder (!%p4202_p1), %s4190_s11, 0 }
  0x6d   : > { %323 = sbr.rel (%p4202_p1) target bundleno = 5182 (0x143e), region = 52  ;;  %s4180_s18 = sshll.u32 (!%p4202_p1), %s3682_s0, 3 }
  0x6e   : > { %s326_s24 = scalar_lea.sflag (!%p4202_p1), [#allocation5], %s3682_s0  ;;  %s329_s17 = scalar_lea.vmem (!%p4202_p1), [#allocation4], %s4180_s18 }
  0x72   : > { %3422 = dma.done.wait (%p4203_p5), %s326_s24, 128  }
  0x73   : > { %3424 = vsyncadd (%p4203_p5), %s326_s24, 4294967168  ;;  %s334_s13 = sand.u32 1, %s3547_s9   ;;  %s337_s22 = scalar_lea.vmem [#allocation7], %s3682_s0 }
  0x74   : > { %s335_s26 = scalar_lea.sflag [#allocation8], %s334_s13 }
  0x75   : > { %3426 = dma.done.wait (%p4203_p5), %s335_s26, 16  }
  0x76   : > { %3428 = vsyncadd (%p4203_p5), %s335_s26, 4294967280  ;;  %p4204_p8 = scmp.eq.s32.totalorder %s3547_s9, 0 }
  0x78   : > { %3430 = dma.done.wait (%p4204_p8), [#allocation8], 128   ;;  %p4205_p11 = pmov %p4204_p8 }
  0x79   : > { %p4206_p2 = pmov %p4204_p8 }
  0x7a   : > { %3432 = vsyncadd (%p4205_p11), [#allocation8], 4294967168 }
  0x7b   : > { %3434 = dma.done.wait (%p4206_p2), [#allocation11], 384   ;;  %p4207_p4 = pmov %p4206_p2 }
  0x7c   : > { %v382_v0 = vld [vmem:[%s329_s17] sm:$0xff]  ;;  %v384_v1 = vld [vmem:[#allocation9] sm:$0xff]  ;;  %vm399_vm0 = vcmask 261120   ;;  %v3463_v11 = vmov 0.0   ;;  %vm3464_vm1 = vmmov 0   ;;  %vm505_vm2 = vcmask 64512  }
  0x7d   : > { %3436 = vsyncadd (%p4207_p4), [#allocation11], 4294966912  ;;  %v383_v2 = vmul.f32 5.656854, %v382_v0  ;;  %v427_v10 = vld [vmem:[%s4170_s4 + $0x18] sm:$0xff]  ;;  %2954 = vmatprep.subr.mxu1 %v3463_v11  ;;  %v426_v12 = vld [vmem:[%s4170_s4 + $0x10] sm:$0xff]  ;;  %2962 = vmatprep.mubr.msk.f32.mxu1 %vm3464_vm1, %v3463_v11  ;;  %v576_v43 = vlaneseq }
  0x7e   : > { %2955 = vmatpush3.msra.mxu1 %v427_v10  ;;  %2975 = vmatprep.subr.mxu0 %v3463_v11  ;;  %v425_v13 = vld [vmem:[%s4170_s4 + $0x8] sm:$0xff]  ;;  %v424_v14 = vld [vmem:[%s4170_s4] sm:$0xff]  ;;  %s3465_s2 = smov 120   ;;  %s3466_s21 = smov 96   ;;  %v3472_v47 = vmov -1e+30  }
  0x7f   : > { %v3706_v3 = vadd.f32 %v384_v1, %v383_v2  ;;  %2956 = vmatprep.subr.mxu1 %v3463_v11  ;;  %2977 = vmatprep.mubr.msk.f32.mxu0 %vm3464_vm1, %v3463_v11  ;;  %v2800_v19 = vld [vmem:[#allocation10] ss:$0 sm:$0xff]  ;;  %v2801_v21 = vld [vmem:[#allocation10 + $0x1] ss:$0 sm:$0xff]  ;;  %v2802_v24 = vld [vmem:[#allocation10 + $0x4] ss:$0 sm:$0xff] }
  0x80   : > { %2957 = vmatpush3.msra.mxu1 %v426_v12  ;;  %s3467_s29 = smov 88   ;;  %s3468_s24 = smov 80   ;;  %v3784_v44 = vld [vmem:[%s337_s22] sm:$0x1]  ;;  %v3786_v45 = vshrl.u32 %v576_v43, 7  ;;  %vm1236_vm4 = vcmask 130112  }
  0x81   : > { %v400_v4 = vsel %vm399_vm0, %v3706_v3, 0.0  ;;  %2958 = vmatprep.subr.mxu1 %v3463_v11  ;;  %s3469_s17 = smov 72   ;;  %s3470_s13 = smov 112   ;;  %vm387_vm3 = vcmp.gt.f32.partialorder %v3784_v44, 0.0  ;;  %vm1242_vm5 = vcmask 195712   ;;  %vm1248_vm6 = vcmask 261312  }
  0x82   : > { %401 = vadd.xlane.f32.xlu0 %v400_v4  ;;  %2959 = vmatpush3.msra.mxu1 %v425_v13  ;;  %s3471_s26 = smov 104   ;;  %v578_v46 = vsub.s32 0, %v3786_v45  ;;  %v388_v48 = vsel %vm387_vm3, 0.0, %v3472_v47  ;;  %s3473_s22 = smov 64   ;;  %vm1447_vm7 = vcmask 523264  }
  0x83   : > { %2960 = vmatprep.subr.mxu1 %v3463_v11  ;;  %s3474_s11 = smov 48   ;;  %s4182_s20 = smov 40  }
  0x84   : > { %2961 = vmatpush3.msra.mxu1 %v424_v14  ;;  %v3794_v49 = vrot.slane %v388_v48, %v578_v46  ;;  %s4181_s3 = smov 56   ;;  %s4185_s14 = smov 8  }
  0x85   : > { %2965 = vmatprep.subr.mxu1 %v3463_v11  ;;  %s4184_s18 = smov 16   ;;  %s4183_s23 = smov 24  }
  0x86   : > { %s4211_s25 = smov 16   ;;  %s4212_s19 = smov 24  }
  0x87   : > { %p4214_p9 = scmp.ne.s32.totalorder %s4197_s16, 0 }
 0x10b   : > { %v402_v5 = vpop.xlane.xlu0 %401 }
 0x10c   : > { %v404_v6 = vmul.f32 0.03125, %v402_v5 }
 0x10e   : > { %v405_v7 = vsub.f32 %v3706_v3, %v404_v6 }
 0x110   : > { %v406_v8 = vmul.f32 %v405_v7, %v405_v7 }
 0x112   : > { %v407_v9 = vsel %vm399_vm0, %v406_v8, 0.0 }
 0x113   : > { %408 = vadd.xlane.f32.xlu0 %v407_v9 }
 0x19c   : > { %v409_v15 = vpop.xlane.xlu0 %408 }
 0x19d   : > { %v410_v16 = vmul.f32 0.03125, %v409_v15 }
 0x19f   : > { %v411_v17 = vadd.f32 1e-12, %v410_v16 }
 0x1a1   : > { %3229 = vrsqrt.f32 %v411_v17 }
 0x1ae   : > { %v3230_v18 = vpop.eup %3229 }
 0x1af   : > { %v413_v20 = vmul.f32 %v3230_v18, %v405_v7 }
 0x1b1   : > { %v418_v22 = vmul.f32 %v2800_v19, %v413_v20 }
 0x1b3   : > { %v423_v23 = vadd.f32 %v2801_v21, %v418_v22 }
 0x1b5   : > { %2963 = vmatmul.mubr.msk.f32.vlgmr.msra.gmra.mxu1 %vm399_vm0, %v423_v23 }
 0x1b6   : > { %2967 = vmatprep.mubr.msk.f32.mxu1 %vm3464_vm1, %v3463_v11 }
 0x275   : > { %v501_v25 = vpop.f32.mrf.mxu1 }
 0x276   : > { %v3737_v26 = vadd.f32 %v2802_v24, %v501_v25 }
 0x277   : > { %v2964_v27 = vpop.f32.mrf.mxu1 }
 0x278   : > { %508 = vrot.lane.b32.xlu0 %v3737_v26, %s3465_s2  ;;  %523 = vrot.lane.b32.xlu1 %v3737_v26, %s3466_s21  ;;  %506 = vst.msk [vmem:[#allocation2] sm:$0xff] %vm505_vm2, %v3737_v26 }
 0x27c   : > { %528 = vrot.lane.b32.xlu1 %v3737_v26, %s3467_s29 }
 0x27f   : > { %v563_v33 = vld [vmem:[#allocation2] sm:$0xff] }
 0x280   : > { %533 = vrot.lane.b32.xlu1 %v3737_v26, %s3468_s24 }
 0x284   : > { %538 = vrot.lane.b32.xlu1 %v3737_v26, %s3469_s17 }
 0x288   : > { %513 = vrot.lane.b32.xlu1 %v3737_v26, %s3470_s13 }
 0x28c   : > { %518 = vrot.lane.b32.xlu1 %v3737_v26, %s3471_s26 }
 0x2ea   : > { %v509_v28 = vpop.permute.xlu0 %508  ;;  %v524_v29 = vpop.permute.xlu1 %523 }
 0x2eb   : > { %512 = vst.msk [vmem:[#allocation2 + $0x8] sm:$0xff] %vm505_vm2, %v509_v28  ;;  %527 = vst.msk [vmem:[#allocation2 + $0x20] sm:$0xff] %vm505_vm2, %v524_v29  ;;  %v2799_v29 = vsel %vm387_vm3, 1.0, %v3463_v11 }
 0x2ee   : > { %v529_v30 = vpop.permute.xlu1 %528 }
 0x2ef   : > { %532 = vst.msk [vmem:[#allocation2 + $0x28] sm:$0xff] %vm505_vm2, %v529_v30  ;;  %v3823_v30 = vrot.slane %v2799_v29, %v578_v46  ;;  %v2818_v29 = vld [vmem:[#allocation10 + $0x2] ss:$0 sm:$0xff] }
 0x2f2   : > { %v534_v31 = vpop.permute.xlu1 %533  ;;  %v567_v32 = vld [vmem:[#allocation2 + $0x20] sm:$0xff]  ;;  %v564_v36 = vld [vmem:[#allocation2 + $0x8] sm:$0xff] }
 0x2f3   : > { %537 = vst.msk [vmem:[#allocation2 + $0x30] sm:$0xff] %vm505_vm2, %v534_v31  ;;  %2966 = vmatpush3.xpose.msk.msra.mxu1 %vm505_vm2, %v567_v32 }
 0x2f4   : > { %2970 = vmatprep.subr.mxu1 %v3463_v11 }
 0x2f6   : > { %v539_v34 = vpop.permute.xlu1 %538  ;;  %2968 = vmatmul.mubr.msk.f32.vlgmr.msra.gmra.mxu1 %vm505_vm2, %v563_v33  ;;  %v568_v35 = vld [vmem:[#allocation2 + $0x28] sm:$0xff] }
 0x2f7   : > { %542 = vst.msk [vmem:[#allocation2 + $0x38] sm:$0xff] %vm505_vm2, %v539_v34  ;;  %2971 = vmatpush3.xpose.msk.msra.mxu1 %vm505_vm2, %v568_v35  ;;  %2972 = vmatprep.mubr.msk.f32.mxu1 %vm3464_vm1, %v3463_v11 }
 0x2f8   : > { %2980 = vmatprep.subr.mxu1 %v3463_v11 }
 0x2fa   : > { %v514_v37 = vpop.permute.xlu1 %513  ;;  %2973 = vmatmul.mubr.msk.f32.vlgmr.msra.gmra.mxu1 %vm505_vm2, %v564_v36  ;;  %v569_v38 = vld [vmem:[#allocation2 + $0x30] sm:$0xff] }
 0x2fb   : > { %517 = vst.msk [vmem:[#allocation2 + $0x10] sm:$0xff] %vm505_vm2, %v514_v37  ;;  %2976 = vmatpush3.xpose.msk.msra.mxu0 %vm505_vm2, %v569_v38  ;;  %2982 = vmatprep.mubr.msk.f32.mxu1 %vm3464_vm1, %v3463_v11 }
 0x2fc   : > { %2985 = vmatprep.subr.mxu0 %v3463_v11 }
 0x2fe   : > { %v519_v39 = vpop.permute.xlu1 %518  ;;  %v570_v40 = vld [vmem:[#allocation2 + $0x38] sm:$0xff] }
 0x2ff   : > { %522 = vst.msk [vmem:[#allocation2 + $0x18] sm:$0xff] %vm505_vm2, %v519_v39  ;;  %2981 = vmatpush3.xpose.msk.msra.mxu1 %vm505_vm2, %v570_v40 }
 0x300   : > { %2990 = vmatprep.subr.mxu1 %v3463_v11 }
 0x302   : > { %v565_v41 = vld [vmem:[#allocation2 + $0x10] sm:$0xff] }
 0x303   : > { %2978 = vmatmul.mubr.msk.f32.vlgmr.msra.gmra.mxu0 %vm505_vm2, %v565_v41 }
 0x304   : > { %2987 = vmatprep.mubr.msk.f32.mxu0 %vm3464_vm1, %v3463_v11 }
 0x306   : > { %v566_v42 = vld [vmem:[#allocation2 + $0x18] sm:$0xff] }
 0x307   : > { %2983 = vmatmul.mubr.msk.f32.vlgmr.msra.gmra.mxu1 %vm505_vm2, %v566_v42 }
 0x308   : > { %2992 = vmatprep.mubr.msk.f32.mxu1 %vm3464_vm1, %v3463_v11 }
 0x3b6   : > { %v653_v50 = vpop.f32.mrf.mxu1 }
 0x3b7   : > { %v654_v51 = vadd.f32 %v653_v50, %v3794_v49 }
 0x3b8   : > { %v2969_v52 = vpop.f32.mrf.mxu1 }
 0x3b9   : > { %v885_v53 = vsel %vm505_vm2, %v654_v51, -inf }
 0x3ba   : > { %886 = vmax.xlane.f32.xlu1 %v885_v53  ;;  %v729_v54 = vpop.f32.mrf.mxu1  ;;  %v1254_v53 = vld [vmem:[%s4171_s5 + $0x18] sm:$0xff] }
 0x3bb   : > { %v730_v55 = vadd.f32 %v729_v54, %v3794_v49  ;;  %v1253_v54 = vld [vmem:[%s4171_s5 + $0x10] sm:$0xff] }
 0x3bc   : > { %v2974_v56 = vpop.f32.mrf.mxu1 }
 0x3bd   : > { %v888_v57 = vsel %vm505_vm2, %v730_v55, -inf  ;;  %v1251_v56 = vld [vmem:[%s4171_s5] sm:$0xff] }
 0x3be   : > { %889 = vmax.xlane.f32.xlu0 %v888_v57 }
 0x3c3   : > { %v805_v58 = vpop.f32.mrf.mxu0 }
 0x3c4   : > { %v806_v59 = vadd.f32 %v805_v58, %v3794_v49 }
 0x3c5   : > { %v2979_v60 = vpop.f32.mrf.mxu0 }
 0x3c6   : > { %v891_v61 = vsel %vm505_vm2, %v806_v59, -inf }
 0x3c7   : > { %892 = vmax.xlane.f32.xlu1 %v891_v61  ;;  %v881_v62 = vpop.f32.mrf.mxu1 }
 0x3c8   : > { %v882_v63 = vadd.f32 %v881_v62, %v3794_v49 }
 0x3c9   : > { %v2984_v0 = vpop.f32.mrf.mxu1 }
 0x3ca   : > { %v894_v1 = vsel %vm505_vm2, %v882_v63, -inf }
 0x3cb   : > { %895 = vmax.xlane.f32.xlu0 %v894_v1 }
 0x3d8   : > { %543 = vrot.lane.b32.xlu1 %v3737_v26, %s3473_s22 }
 0x443   : > { %v887_v2 = vpop.xlane.xlu1 %886 }
 0x444   : > { %v897_v4 = vsub.f32 %v654_v51, %v887_v2 }
 0x446   : > { %v901_v5 = vmul.f32 1.442695, %v897_v4  ;;  %v2817_v4 = vld [vmem:[#allocation10 + $0x5] ss:$0 sm:$0xff] }
 0x447   : > { %v890_v6 = vpop.xlane.xlu0 %889 }
 0x448   : > { %3231 = vpow2.f32 %v901_v5  ;;  %v898_v7 = vsub.f32 %v730_v55, %v890_v6  ;;  %v1252_v55 = vld [vmem:[%s4171_s5 + $0x8] sm:$0xff] }
 0x44a   : > { %v903_v8 = vmul.f32 1.442695, %v898_v7 }
 0x44c   : > { %3233 = vpow2.f32 %v903_v8 }
 0x450   : > { %v893_v9 = vpop.xlane.xlu1 %892 }
 0x451   : > { %v899_v10 = vsub.f32 %v806_v59, %v893_v9 }
 0x453   : > { %v905_v12 = vmul.f32 1.442695, %v899_v10 }
 0x454   : > { %v544_v13 = vpop.permute.xlu1 %543  ;;  %v896_v14 = vpop.xlane.xlu0 %895 }
 0x455   : > { %v3232_v15 = vpop.eup %3231  ;;  %3235 = vpow2.f32 %v905_v12  ;;  %547 = vst.msk [vmem:[#allocation2 + $0x40] sm:$0xff] %vm505_vm2, %v544_v13  ;;  %v900_v16 = vsub.f32 %v882_v63, %v896_v14 }
 0x456   : > { %v909_v17 = vsel %vm505_vm2, %v3232_v15, 0.0 }
 0x457   : > { %v907_v18 = vmul.f32 1.442695, %v900_v16  ;;  %910 = vadd.xlane.f32.xlu1 %v909_v17  ;;  %v1360_v16 = vld [vmem:[%s4172_s6 + $0x18] sm:$0xff]  ;;  %v1358_v17 = vld [vmem:[%s4172_s6 + $0x8] sm:$0xff] }
 0x459   : > { %v3234_v19 = vpop.eup %3233  ;;  %3237 = vpow2.f32 %v907_v18  ;;  %v1357_v18 = vld [vmem:[%s4172_s6] sm:$0xff] }
 0x45a   : > { %v912_v20 = vsel %vm505_vm2, %v3234_v19, 0.0 }
 0x45b   : > { %913 = vadd.xlane.f32.xlu0 %v912_v20  ;;  %v1445_v20 = vld [vmem:[%s4173_s7 + $0x30] sm:$0xff] }
 0x45c   : > { %v571_v21 = vld [vmem:[#allocation2 + $0x40] sm:$0xff] }
 0x45d   : > { %2986 = vmatpush3.msra.mxu0 %v571_v21  ;;  %v1444_v21 = vld [vmem:[%s4173_s7 + $0x28] sm:$0xff] }
 0x45e   : > { %2995 = vmatprep.subr.mxu0 %v3463_v11 }
 0x462   : > { %v3236_v22 = vpop.eup %3235 }
 0x463   : > { %v915_v23 = vsel %vm505_vm2, %v3236_v22, 0.0 }
 0x464   : > { %916 = vadd.xlane.f32.xlu1 %v915_v23  ;;  %v1442_v23 = vld [vmem:[%s4173_s7 + $0x18] sm:$0xff] }
 0x466   : > { %v3238_v24 = vpop.eup %3237 }
 0x467   : > { %v918_v25 = vsel %vm505_vm2, %v3238_v24, 0.0 }
 0x468   : > { %919 = vadd.xlane.f32.xlu0 %v918_v25 }
 0x475   : > { %553 = vrot.lane.b32.xlu1 %v3737_v26, %s3474_s11 }
 0x479   : > { %558 = vrot.lane.b32.xlu1 %v3737_v26, %s4182_s20 }
 0x47e   : > { %548 = vrot.lane.b32.xlu0 %v3737_v26, %s4181_s3  ;;  %s4210_s3 = smov 8  }
 0x4e0   : > { %v911_v27 = vpop.xlane.xlu1 %910 }
 0x4e1   : > { %3239 = vrcp.f32 %v911_v27 }
 0x4e4   : > { %v914_v28 = vpop.xlane.xlu0 %913 }
 0x4e5   : > { %3241 = vrcp.f32 %v914_v28 }
 0x4ed   : > { %v917_v31 = vpop.xlane.xlu1 %916 }
 0x4ee   : > { %v3240_v32 = vpop.eup %3239  ;;  %3243 = vrcp.f32 %v917_v31 }
 0x4ef   : > { %v925_v33 = vmul.f32 %v3240_v32, %v3232_v15  ;;  %v2819_v32 = vld [vmem:[#allocation10 + $0x3] ss:$0 sm:$0xff] }
 0x4f1   : > { %v554_v34 = vpop.permute.xlu1 %553  ;;  %v920_v35 = vpop.xlane.xlu0 %919  ;;  %v935_v26 = vmul.f32 %v3823_v30, %v925_v33 }
 0x4f2   : > { %557 = vst.msk [vmem:[#allocation2 + $0x50] sm:$0xff] %vm505_vm2, %v554_v34  ;;  %3245 = vrcp.f32 %v920_v35  ;;  %v3242_v38 = vpop.eup %3241  ;;  %v1441_v35 = vld [vmem:[%s4173_s7 + $0x10] sm:$0xff] }
 0x4f3   : > { %2988 = vmatmul.mubr.msk.f32.vlgmr.msra.gmra.mxu0 %vm505_vm2, %v935_v26  ;;  %v926_v40 = vmul.f32 %v3242_v38, %v3234_v19  ;;  %v1446_v19 = vld [vmem:[%s4173_s7 + $0x38] sm:$0xff]  ;;  %v1440_v26 = vld [vmem:[%s4173_s7 + $0x8] sm:$0xff] }
 0x4f4   : > { %2997 = vmatprep.mubr.msk.f32.mxu0 %vm3464_vm1, %v3463_v11 }
 0x4f5   : > { %v559_v36 = vpop.permute.xlu1 %558  ;;  %v549_v37 = vpop.permute.xlu0 %548  ;;  %v936_v44 = vmul.f32 %v3823_v30, %v926_v40 }
 0x4f6   : > { %562 = vst.msk [vmem:[#allocation2 + $0x58] sm:$0xff] %vm505_vm2, %v559_v36  ;;  %552 = vst.msk [vmem:[#allocation2 + $0x48] sm:$0xff] %vm505_vm2, %v549_v37  ;;  %v1439_v36 = vld [vmem:[%s4173_s7] sm:$0xff]  ;;  %v2820_v37 = vld [vmem:[#allocation10 + $0x6] ss:$0 sm:$0xff] }
 0x4f9   : > { %v573_v39 = vld [vmem:[#allocation2 + $0x50] sm:$0xff] }
 0x4fa   : > { %2996 = vmatpush3.msra.mxu0 %v573_v39 }
 0x4fb   : > { %v3244_v41 = vpop.eup %3243  ;;  %3005 = vmatprep.subr.mxu0 %v3463_v11 }
 0x4fc   : > { %v927_v42 = vmul.f32 %v3244_v41, %v3236_v22  ;;  %v1443_v22 = vld [vmem:[%s4173_s7 + $0x20] sm:$0xff] }
 0x4fd   : > { %v572_v43 = vld [vmem:[#allocation2 + $0x48] sm:$0xff]  ;;  %v574_v47 = vld [vmem:[#allocation2 + $0x58] sm:$0xff] }
 0x4fe   : > { %2991 = vmatpush3.msra.mxu1 %v572_v43  ;;  %v937_v45 = vmul.f32 %v3823_v30, %v927_v42  ;;  %v2823_v42 = vld [vmem:[#allocation10 + $0x7] ss:$0 sm:$0xff] }
 0x4ff   : > { %v3246_v46 = vpop.eup %3245  ;;  %2993 = vmatmul.mubr.msk.f32.vlgmr.msra.gmra.mxu1 %vm505_vm2, %v936_v44  ;;  %3000 = vmatprep.subr.mxu1 %v3463_v11 }
 0x500   : > { %2998 = vmatmul.mubr.msk.f32.vlgmr.msra.gmra.mxu0 %vm505_vm2, %v937_v45  ;;  %3001 = vmatpush3.msra.mxu1 %v574_v47  ;;  %v928_v48 = vmul.f32 %v3246_v46, %v3238_v24 }
 0x501   : > { %3002 = vmatprep.mubr.msk.f32.mxu1 %vm3464_vm1, %v3463_v11  ;;  %3013 = vmatprep.mubr.msk.f32.mxu0 %vm3464_vm1, %v3463_v11 }
 0x502   : > { %v938_v50 = vmul.f32 %v3823_v30, %v928_v48  ;;  %3016 = vmatprep.subr.mxu1 %v3463_v11  ;;  %3006 = vmatpush3.msra.mxu0 %v1254_v53 }
 0x503   : > { %3007 = vmatprep.subr.mxu0 %v3463_v11 }
 0x504   : > { %3003 = vmatmul.mubr.msk.f32.vlgmr.msra.gmra.mxu1 %vm505_vm2, %v938_v50  ;;  %3008 = vmatpush3.msra.mxu0 %v1253_v54  ;;  %v2829_v54 = vld [vmem:[%s4170_s4 + $0x38] sm:$0xff] }
 0x505   : > { %3024 = vmatprep.mubr.msk.f32.mxu1 %vm3464_vm1, %v3463_v11  ;;  %3009 = vmatprep.subr.mxu0 %v3463_v11 }
 0x506   : > { %3010 = vmatpush3.msra.mxu0 %v1252_v55  ;;  %3017 = vmatpush3.msra.mxu1 %v1360_v16  ;;  %v2828_v55 = vld [vmem:[%s4170_s4 + $0x30] sm:$0xff] }
 0x507   : > { %3011 = vmatprep.subr.mxu0 %v3463_v11  ;;  %3018 = vmatprep.subr.mxu1 %v3463_v11 }
 0x508   : > { %3012 = vmatpush3.msra.mxu0 %v1251_v56  ;;  %v2827_v56 = vld [vmem:[%s4170_s4 + $0x28] sm:$0xff] }
 0x509   : > { %3027 = vmatprep.subr.mxu0 %v3463_v11 }
 0x5b3   : > { %v1008_v51 = vpop.f32.mrf.mxu0 }
 0x5b4   : > { %1231 = vst.msk [vmem:[#allocation3] sm:$0xff] %vm505_vm2, %v1008_v51 }
 0x5b5   : > { %v2989_v52 = vpop.f32.mrf.mxu0 }
 0x5bf   : > { %v1081_v57 = vpop.f32.mrf.mxu1 }
 0x5c0   : > { %v1154_v58 = vpop.f32.mrf.mxu0  ;;  %1233 = vrot.lane.b32.xlu0 %v1081_v57, %s4185_s14  ;;  %v2826_v57 = vld [vmem:[%s4170_s4 + $0x20] sm:$0xff] }
 0x5c1   : > { %1239 = vrot.lane.b32.xlu1 %v1154_v58, %s4184_s18  ;;  %v2994_v59 = vpop.f32.mrf.mxu1 }
 0x5c2   : > { %v2999_v60 = vpop.f32.mrf.mxu0 }
 0x5c4   : > { %v1227_v61 = vpop.f32.mrf.mxu1 }
 0x5c5   : > { %1245 = vrot.lane.b32.xlu0 %v1227_v61, %s4183_s23 }
 0x5c6   : > { %v3004_v62 = vpop.f32.mrf.mxu1 }
 0x5c7   : > { %v2824_v62 = vld [vmem:[#allocation10 + $0x8] ss:$0 sm:$0xff] }
 0x632   : > { %v1234_v63 = vpop.permute.xlu0 %1233 }
 0x633   : > { %1237 = vst.msk [vmem:[#allocation3] sm:$0xff] %vm1236_vm4, %v1234_v63  ;;  %v1240_v0 = vpop.permute.xlu1 %1239 }
 0x634   : > { %1243 = vst.msk [vmem:[#allocation3] sm:$0xff] %vm1242_vm5, %v1240_v0  ;;  %v2825_v0 = vld [vmem:[#allocation10 + $0x9] ss:$0 sm:$0xff] }
 0x637   : > { %v1246_v1 = vpop.permute.xlu0 %1245 }
 0x638   : > { %1249 = vst.msk [vmem:[#allocation3] sm:$0xff] %vm1248_vm6, %v1246_v1 }
 0x63f   : > { %v1250_v2 = vld [vmem:[#allocation3] sm:$0xff] }
 0x640   : > { %3014 = vmatmul.mubr.msk.f32.vlgmr.msra.gmra.mxu0 %vm399_vm0, %v1250_v2 }
 0x641   : > { %3043 = vmatprep.mubr.msk.f32.mxu0 %vm3464_vm1, %v3463_v11  ;;  %3028 = vmatpush3.msra.mxu0 %v1446_v19 }
 0x642   : > { %3029 = vmatprep.subr.mxu0 %v3463_v11 }
 0x643   : > { %3030 = vmatpush3.msra.mxu0 %v1445_v20 }
 0x644   : > { %3031 = vmatprep.subr.mxu0 %v3463_v11 }
 0x645   : > { %3032 = vmatpush3.msra.mxu0 %v1444_v21 }
 0x646   : > { %3033 = vmatprep.subr.mxu0 %v3463_v11 }
 0x647   : > { %3034 = vmatpush3.msra.mxu0 %v1443_v22 }
 0x648   : > { %3035 = vmatprep.subr.mxu0 %v3463_v11 }
 0x649   : > { %3036 = vmatpush3.msra.mxu0 %v1442_v23 }
 0x64a   : > { %3037 = vmatprep.subr.mxu0 %v3463_v11 }
 0x64b   : > { %3038 = vmatpush3.msra.mxu0 %v1441_v35 }
 0x64c   : > { %3039 = vmatprep.subr.mxu0 %v3463_v11 }
 0x64d   : > { %3040 = vmatpush3.msra.mxu0 %v1440_v26 }
 0x64e   : > { %3041 = vmatprep.subr.mxu0 %v3463_v11 }
 0x64f   : > { %3042 = vmatpush3.msra.mxu0 %v1439_v36 }
 0x650   : > { %3067 = vmatprep.subr.mxu0 %v3463_v11 }
 0x700   : > { %v1324_v5 = vpop.f32.mrf.mxu0 }
 0x701   : > { %v1328_v6 = vadd.f32 %v1324_v5, %v3706_v3  ;;  %v1359_v3 = vld [vmem:[%s4172_s6 + $0x10] sm:$0xff] }
 0x702   : > { %v3015_v7 = vpop.f32.mrf.mxu0  ;;  %3019 = vmatpush3.msra.mxu1 %v1359_v3 }
 0x703   : > { %v3874_v8 = vadd.f32 %v2817_v4, %v1328_v6  ;;  %3020 = vmatprep.subr.mxu1 %v3463_v11  ;;  %v2830_v4 = vld [vmem:[#allocation10 + $0xc] ss:$0 sm:$0xff] }
 0x704   : > { %3021 = vmatpush3.msra.mxu1 %v1358_v17 }
 0x705   : > { %v1334_v9 = vsel %vm399_vm0, %v3874_v8, 0.0  ;;  %3022 = vmatprep.subr.mxu1 %v3463_v11 }
 0x706   : > { %1335 = vadd.xlane.f32.xlu1 %v1334_v9  ;;  %3023 = vmatpush3.msra.mxu1 %v1357_v18 }
 0x707   : > { %3046 = vmatprep.subr.mxu1 %v3463_v11 }
 0x78f   : > { %v1336_v10 = vpop.xlane.xlu1 %1335 }
 0x790   : > { %v1337_v12 = vmul.f32 0.03125, %v1336_v10 }
 0x792   : > { %v1338_v13 = vsub.f32 %v3874_v8, %v1337_v12 }
 0x794   : > { %v1339_v14 = vmul.f32 %v1338_v13, %v1338_v13 }
 0x796   : > { %v1340_v15 = vsel %vm399_vm0, %v1339_v14, 0.0 }
 0x797   : > { %1341 = vadd.xlane.f32.xlu0 %v1340_v15 }
 0x820   : > { %v1342_v24 = vpop.xlane.xlu0 %1341 }
 0x821   : > { %v1343_v25 = vmul.f32 0.03125, %v1342_v24 }
 0x823   : > { %v1344_v27 = vadd.f32 1e-12, %v1343_v25 }
 0x825   : > { %3247 = vrsqrt.f32 %v1344_v27 }
 0x832   : > { %v3248_v28 = vpop.eup %3247 }
 0x833   : > { %v1346_v31 = vmul.f32 %v3248_v28, %v1338_v13 }
 0x835   : > { %v1351_v33 = vmul.f32 %v2818_v29, %v1346_v31 }
 0x837   : > { %v1356_v34 = vadd.f32 %v2819_v32, %v1351_v33 }
 0x839   : > { %3025 = vmatmul.mubr.msk.f32.vlgmr.msra.gmra.mxu1 %vm399_vm0, %v1356_v34 }
 0x83a   : > { %3054 = vmatprep.mubr.msk.f32.mxu1 %vm3464_vm1, %v3463_v11  ;;  %3047 = vmatpush3.msra.mxu1 %v2829_v54 }
 0x83b   : > { %3048 = vmatprep.subr.mxu1 %v3463_v11 }
 0x83c   : > { %3049 = vmatpush3.msra.mxu1 %v2828_v55 }
 0x83d   : > { %3050 = vmatprep.subr.mxu1 %v3463_v11 }
 0x83e   : > { %3051 = vmatpush3.msra.mxu1 %v2827_v56 }
 0x83f   : > { %3052 = vmatprep.subr.mxu1 %v3463_v11 }
 0x840   : > { %3053 = vmatpush3.msra.mxu1 %v2826_v57 }
 0x841   : > { %3057 = vmatprep.subr.mxu1 %v3463_v11 }
 0x8f9   : > { %v1434_v38 = vpop.f32.mrf.mxu1 }
 0x8fa   : > { %v1435_v39 = vadd.f32 %v2820_v37, %v1434_v38 }
 0x8fb   : > { %v3026_v40 = vpop.f32.mrf.mxu1 }
 0x8fc   : > { %v1438_v41 = vmax.f32 %v1435_v39, 0.0 }
 0x8fe   : > { %3044 = vmatmul.mubr.msk.f32.vlgmr.msra.gmra.mxu0 %vm1447_vm7, %v1438_v41 }
 0x8ff   : > { %3069 = vmatprep.mubr.msk.f32.mxu0 %vm3464_vm1, %v3463_v11 }
 0x9be   : > { %v1517_v43 = vpop.f32.mrf.mxu0 }
 0x9bf   : > { %v1521_v44 = vadd.f32 %v1517_v43, %v3874_v8 }
 0x9c0   : > { %v3045_v45 = vpop.f32.mrf.mxu0 }
 0x9c1   : > { %v3935_v46 = vadd.f32 %v2823_v42, %v1521_v44 }
 0x9c3   : > { %v1535_v47 = vsel %vm399_vm0, %v3935_v46, 0.0 }
 0x9c4   : > { %1536 = vadd.xlane.f32.xlu0 %v1535_v47 }
 0xa4d   : > { %v1537_v48 = vpop.xlane.xlu0 %1536 }
 0xa4e   : > { %v1538_v50 = vmul.f32 0.03125, %v1537_v48 }
 0xa50   : > { %v1539_v51 = vsub.f32 %v3935_v46, %v1538_v50 }
 0xa52   : > { %v1540_v52 = vmul.f32 %v1539_v51, %v1539_v51 }
 0xa54   : > { %v1541_v53 = vsel %vm399_vm0, %v1540_v52, 0.0 }
 0xa55   : > { %1542 = vadd.xlane.f32.xlu1 %v1541_v53 }
 0xade   : > { %v1543_v58 = vpop.xlane.xlu1 %1542 }
 0xadf   : > { %v1544_v59 = vmul.f32 0.03125, %v1543_v58 }
 0xae1   : > { %v1545_v60 = vadd.f32 1e-12, %v1544_v59 }
 0xae3   : > { %3249 = vrsqrt.f32 %v1545_v60 }
 0xaf0   : > { %v3250_v61 = vpop.eup %3249 }
 0xaf1   : > { %v1547_v63 = vmul.f32 %v3250_v61, %v1539_v51 }
 0xaf3   : > { %v1552_v1 = vmul.f32 %v2824_v62, %v1547_v63 }
 0xaf5   : > { %v1557_v2 = vadd.f32 %v2825_v0, %v1552_v1 }
 0xaf7   : > { %3055 = vmatmul.mubr.msk.f32.vlgmr.msra.gmra.mxu1 %vm399_vm0, %v1557_v2 }
 0xaf8   : > { %3059 = vmatprep.mubr.msk.f32.mxu1 %vm3464_vm1, %v3463_v11 }
 0xbb7   : > { %v1636_v5 = vpop.f32.mrf.mxu1 }
 0xbb8   : > { %v3960_v6 = vadd.f32 %v2830_v4, %v1636_v5 }
 0xbb9   : > { %v3056_v7 = vpop.f32.mrf.mxu1 }
 0xbba   : > { %1640 = vst.msk [vmem:[#allocation2] sm:$0xff] %vm505_vm2, %v3960_v6  ;;  %1658 = vrot.lane.b32.xlu1 %v3960_v6, %s3467_s29  ;;  %1654 = vrot.lane.b32.xlu0 %v3960_v6, %s3466_s21  ;;  %s4209_s21 = smov 56  }
 0xbbe   : > { %1642 = vrot.lane.b32.xlu1 %v3960_v6, %s3465_s2  ;;  %1662 = vrot.lane.b32.xlu0 %v3960_v6, %s3468_s24  ;;  %s4208_s2 = smov 40   ;;  %s2871_s24 = sshll.u32 %s3547_s9, 7 }
 0xbbf   : > { %s2675_s20 = scalar_lea.hbm %s4174_s8, %s2871_s24 }
 0xbc1   : > { %v1686_v16 = vld [vmem:[#allocation2] sm:$0xff] }
 0xbc2   : > { %1666 = vrot.lane.b32.xlu1 %v3960_v6, %s3469_s17  ;;  %1646 = vrot.lane.b32.xlu0 %v3960_v6, %s3470_s13  ;;  %s4213_s17 = sshll.u32 %s3682_s0, 3 }
 0xbc3   : > { %s381_s13 = scalar_lea.vmem [#allocation12], %s4213_s17 }
 0xbc6   : > { %1650 = vrot.lane.b32.xlu1 %v3960_v6, %s3471_s26  ;;  %s2677_s26 = sshll.u32 %s381_s13, 4  ;;  %s2678_s26 = int_to_ptr.vmem [resolvable:$true] %s2677_s26 }
 0xc2c   : > { %v1659_v8 = vpop.permute.xlu1 %1658  ;;  %v1655_v9 = vpop.permute.xlu0 %1654 }
 0xc2d   : > { %1661 = vst.msk [vmem:[#allocation2 + $0x28] sm:$0xff] %vm505_vm2, %v1659_v8  ;;  %1657 = vst.msk [vmem:[#allocation2 + $0x20] sm:$0xff] %vm505_vm2, %v1655_v9 }
 0xc30   : > { %v1643_v10 = vpop.permute.xlu1 %1642  ;;  %v1663_v12 = vpop.permute.xlu0 %1662 }
 0xc31   : > { %1645 = vst.msk [vmem:[#allocation2 + $0x8] sm:$0xff] %vm505_vm2, %v1643_v10  ;;  %1665 = vst.msk [vmem:[#allocation2 + $0x30] sm:$0xff] %vm505_vm2, %v1663_v12 }
 0xc34   : > { %v1667_v13 = vpop.permute.xlu1 %1666  ;;  %v1647_v14 = vpop.permute.xlu0 %1646  ;;  %v1690_v15 = vld [vmem:[#allocation2 + $0x20] sm:$0xff]  ;;  %v1691_v17 = vld [vmem:[#allocation2 + $0x28] sm:$0xff] }
 0xc35   : > { %1669 = vst.msk [vmem:[#allocation2 + $0x38] sm:$0xff] %vm505_vm2, %v1667_v13  ;;  %1649 = vst.msk [vmem:[#allocation2 + $0x10] sm:$0xff] %vm505_vm2, %v1647_v14  ;;  %3058 = vmatpush3.xpose.msk.msra.mxu1 %vm505_vm2, %v1690_v15 }
 0xc36   : > { %3062 = vmatprep.subr.mxu1 %v3463_v11 }
 0xc38   : > { %v1651_v3 = vpop.permute.xlu1 %1650  ;;  %3060 = vmatmul.mubr.msk.f32.vlgmr.msra.gmra.mxu1 %vm505_vm2, %v1686_v16  ;;  %v1692_v18 = vld [vmem:[#allocation2 + $0x30] sm:$0xff]  ;;  %v1687_v19 = vld [vmem:[#allocation2 + $0x8] sm:$0xff] }
 0xc39   : > { %1653 = vst.msk [vmem:[#allocation2 + $0x18] sm:$0xff] %vm505_vm2, %v1651_v3  ;;  %3063 = vmatpush3.xpose.msk.msra.mxu1 %vm505_vm2, %v1691_v17  ;;  %3068 = vmatpush3.xpose.msk.msra.mxu0 %vm505_vm2, %v1692_v18 }
 0xc3a   : > { %3064 = vmatprep.mubr.msk.f32.mxu1 %vm3464_vm1, %v3463_v11  ;;  %3072 = vmatprep.subr.mxu1 %v3463_v11 }
 0xc3b   : > { %3077 = vmatprep.subr.mxu0 %v3463_v11 }
 0xc3c   : > { %3065 = vmatmul.mubr.msk.f32.vlgmr.msra.gmra.mxu1 %vm505_vm2, %v1687_v19  ;;  %v1688_v20 = vld [vmem:[#allocation2 + $0x10] sm:$0xff]  ;;  %v1693_v21 = vld [vmem:[#allocation2 + $0x38] sm:$0xff] }
 0xc3d   : > { %3070 = vmatmul.mubr.msk.f32.vlgmr.msra.gmra.mxu0 %vm505_vm2, %v1688_v20  ;;  %3073 = vmatpush3.xpose.msk.msra.mxu1 %vm505_vm2, %v1693_v21 }
 0xc3e   : > { %3074 = vmatprep.mubr.msk.f32.mxu1 %vm3464_vm1, %v3463_v11  ;;  %3079 = vmatprep.mubr.msk.f32.mxu0 %vm3464_vm1, %v3463_v11 }
 0xc3f   : > { %3082 = vmatprep.subr.mxu1 %v3463_v11 }
 0xc40   : > { %v1689_v22 = vld [vmem:[#allocation2 + $0x18] sm:$0xff] }
 0xc41   : > { %3075 = vmatmul.mubr.msk.f32.vlgmr.msra.gmra.mxu1 %vm505_vm2, %v1689_v22  ;;  %v2847_v22 = vld [vmem:[%s4171_s5 + $0x38] sm:$0xff] }
 0xc42   : > { %3084 = vmatprep.mubr.msk.f32.mxu1 %vm3464_vm1, %v3463_v11 }
 0xcf8   : > { %v1770_v23 = vpop.f32.mrf.mxu1 }
 0xcf9   : > { %v1771_v24 = vadd.f32 %v1770_v23, %v3794_v49  ;;  %v2846_v23 = vld [vmem:[%s4171_s5 + $0x30] sm:$0xff] }
 0xcfa   : > { %v3061_v25 = vpop.f32.mrf.mxu1 }
 0xcfb   : > { %v2002_v27 = vsel %vm505_vm2, %v1771_v24, -inf  ;;  %v2844_v25 = vld [vmem:[%s4171_s5 + $0x20] sm:$0xff] }
 0xcfc   : > { %2003 = vmax.xlane.f32.xlu0 %v2002_v27  ;;  %v1846_v28 = vpop.f32.mrf.mxu1 }
 0xcfd   : > { %v1847_v29 = vadd.f32 %v1846_v28, %v3794_v49  ;;  %v1922_v31 = vpop.f32.mrf.mxu0 }
 0xcfe   : > { %v1923_v32 = vadd.f32 %v1922_v31, %v3794_v49  ;;  %v3066_v33 = vpop.f32.mrf.mxu1 }
 0xcff   : > { %v3071_v34 = vpop.f32.mrf.mxu0  ;;  %v2005_v35 = vsel %vm505_vm2, %v1847_v29, -inf }
 0xd00   : > { %2006 = vmax.xlane.f32.xlu1 %v2005_v35  ;;  %v2008_v26 = vsel %vm505_vm2, %v1923_v32, -inf }
 0xd01   : > { %2009 = vmax.xlane.f32.xlu0 %v2008_v26  ;;  %v1998_v36 = vpop.f32.mrf.mxu1 }
 0xd02   : > { %v1999_v37 = vadd.f32 %v1998_v36, %v3794_v49 }
 0xd03   : > { %v3076_v38 = vpop.f32.mrf.mxu1 }
 0xd04   : > { %v2011_v39 = vsel %vm505_vm2, %v1999_v37, -inf  ;;  %v2849_v38 = vld [vmem:[#allocation10 + $0xd] ss:$0 sm:$0xff] }
 0xd05   : > { %2012 = vmax.xlane.f32.xlu0 %v2011_v39 }
 0xd11   : > { %1670 = vrot.lane.b32.xlu1 %v3960_v6, %s3473_s22 }
 0xd85   : > { %v2004_v40 = vpop.xlane.xlu0 %2003 }
 0xd86   : > { %v2014_v41 = vsub.f32 %v1771_v24, %v2004_v40 }
 0xd88   : > { %v2018_v42 = vmul.f32 1.442695, %v2014_v41 }
 0xd89   : > { %v2007_v43 = vpop.xlane.xlu1 %2006 }
 0xd8a   : > { %3251 = vpow2.f32 %v2018_v42  ;;  %v2015_v44 = vsub.f32 %v1847_v29, %v2007_v43  ;;  %v2010_v45 = vpop.xlane.xlu0 %2009 }
 0xd8b   : > { %v2016_v47 = vsub.f32 %v1923_v32, %v2010_v45 }
 0xd8c   : > { %v2020_v48 = vmul.f32 1.442695, %v2015_v44 }
 0xd8d   : > { %v2022_v50 = vmul.f32 1.442695, %v2016_v47  ;;  %v1671_v51 = vpop.permute.xlu1 %1670 }
 0xd8e   : > { %3253 = vpow2.f32 %v2020_v48  ;;  %1673 = vst.msk [vmem:[#allocation2 + $0x40] sm:$0xff] %vm505_vm2, %v1671_v51  ;;  %v2013_v49 = vpop.xlane.xlu0 %2012  ;;  %v2855_v51 = vld [vmem:[%s4172_s6 + $0x38] sm:$0xff] }
 0xd8f   : > { %3255 = vpow2.f32 %v2022_v50  ;;  %v2017_v52 = vsub.f32 %v1999_v37, %v2013_v49  ;;  %v2853_v49 = vld [vmem:[%s4172_s6 + $0x28] sm:$0xff] }
 0xd91   : > { %v2024_v53 = vmul.f32 1.442695, %v2017_v52  ;;  %v2852_v52 = vld [vmem:[%s4172_s6 + $0x20] sm:$0xff] }
 0xd93   : > { %3257 = vpow2.f32 %v2024_v53  ;;  %v2865_v53 = vld [vmem:[%s4173_s7 + $0x78] sm:$0xff] }
 0xd95   : > { %v1694_v54 = vld [vmem:[#allocation2 + $0x40] sm:$0xff] }
 0xd96   : > { %3078 = vmatpush3.msra.mxu0 %v1694_v54  ;;  %v2864_v54 = vld [vmem:[%s4173_s7 + $0x70] sm:$0xff] }
 0xd97   : > { %v3252_v55 = vpop.eup %3251  ;;  %3087 = vmatprep.subr.mxu0 %v3463_v11 }
 0xd98   : > { %v2026_v56 = vsel %vm505_vm2, %v3252_v55, 0.0 }
 0xd99   : > { %2027 = vadd.xlane.f32.xlu1 %v2026_v56  ;;  %v2862_v56 = vld [vmem:[%s4173_s7 + $0x60] sm:$0xff] }
 0xd9b   : > { %v3254_v57 = vpop.eup %3253 }
 0xd9c   : > { %v3256_v58 = vpop.eup %3255  ;;  %v2029_v59 = vsel %vm505_vm2, %v3254_v57, 0.0 }
 0xd9d   : > { %2030 = vadd.xlane.f32.xlu0 %v2029_v59  ;;  %v2032_v60 = vsel %vm505_vm2, %v3256_v58, 0.0 }
 0xd9e   : > { %2033 = vadd.xlane.f32.xlu1 %v2032_v60 }
 0xda0   : > { %v3258_v61 = vpop.eup %3257 }
 0xda1   : > { %v2035_v62 = vsel %vm505_vm2, %v3258_v61, 0.0 }
 0xda2   : > { %2036 = vadd.xlane.f32.xlu0 %v2035_v62  ;;  %v2850_v62 = vld [vmem:[#allocation10 + $0xa] ss:$0 sm:$0xff] }
 0xdaf   : > { %1678 = vrot.lane.b32.xlu1 %v3960_v6, %s3474_s11 }
 0xdb3   : > { %1682 = vrot.lane.b32.xlu1 %v3960_v6, %s4208_s2 }
 0xdb8   : > { %1674 = vrot.lane.b32.xlu0 %v3960_v6, %s4209_s21 }
 0xe22   : > { %v2028_v63 = vpop.xlane.xlu1 %2027 }
 0xe23   : > { %3259 = vrcp.f32 %v2028_v63 }
 0xe26   : > { %v2031_v0 = vpop.xlane.xlu0 %2030 }
 0xe27   : > { %3261 = vrcp.f32 %v2031_v0  ;;  %v2034_v1 = vpop.xlane.xlu1 %2033  ;;  %v2851_v0 = vld [vmem:[#allocation10 + $0xb] ss:$0 sm:$0xff] }
 0xe28   : > { %3263 = vrcp.f32 %v2034_v1 }
 0xe2b   : > { %v1679_v2 = vpop.permute.xlu1 %1678  ;;  %v2037_v4 = vpop.xlane.xlu0 %2036 }
 0xe2c   : > { %1681 = vst.msk [vmem:[#allocation2 + $0x50] sm:$0xff] %vm505_vm2, %v1679_v2  ;;  %3265 = vrcp.f32 %v2037_v4  ;;  %v2860_v4 = vld [vmem:[%s4173_s7 + $0x50] sm:$0xff] }
 0xe2f   : > { %v1683_v5 = vpop.permute.xlu1 %1682  ;;  %v1675_v7 = vpop.permute.xlu0 %1674 }
 0xe30   : > { %v3260_v8 = vpop.eup %3259  ;;  %1685 = vst.msk [vmem:[#allocation2 + $0x58] sm:$0xff] %vm505_vm2, %v1683_v5  ;;  %1677 = vst.msk [vmem:[#allocation2 + $0x48] sm:$0xff] %vm505_vm2, %v1675_v7  ;;  %v2859_v5 = vld [vmem:[%s4173_s7 + $0x48] sm:$0xff]  ;;  %v2858_v7 = vld [vmem:[%s4173_s7 + $0x40] sm:$0xff] }
 0xe31   : > { %v2042_v9 = vmul.f32 %v3260_v8, %v3252_v55  ;;  %v2863_v55 = vld [vmem:[%s4173_s7 + $0x68] sm:$0xff]  ;;  %v2856_v8 = vld [vmem:[#allocation10 + $0xe] ss:$0 sm:$0xff] }
 0xe33   : > { %v2046_v6 = vmul.f32 %v2042_v9, %v3823_v30  ;;  %v1696_v10 = vld [vmem:[#allocation2 + $0x50] sm:$0xff] }
 0xe34   : > { %v3262_v12 = vpop.eup %3261 }
 0xe35   : > { %v3264_v13 = vpop.eup %3263  ;;  %3080 = vmatmul.mubr.msk.f32.vlgmr.msra.gmra.mxu0 %vm505_vm2, %v2046_v6  ;;  %v2043_v14 = vmul.f32 %v3262_v12, %v3254_v57  ;;  %v2861_v57 = vld [vmem:[%s4173_s7 + $0x58] sm:$0xff] }
 0xe36   : > { %3088 = vmatpush3.msra.mxu0 %v1696_v10  ;;  %3089 = vmatprep.mubr.msk.f32.mxu0 %vm3464_vm1, %v3463_v11  ;;  %v2044_v15 = vmul.f32 %v3264_v13, %v3256_v58 }
 0xe37   : > { %v1695_v16 = vld [vmem:[#allocation2 + $0x48] sm:$0xff]  ;;  %v2047_v3 = vmul.f32 %v2043_v14, %v3823_v30  ;;  %3097 = vmatprep.subr.mxu0 %v3463_v11  ;;  %v1697_v19 = vld [vmem:[#allocation2 + $0x58] sm:$0xff]  ;;  %v2867_v14 = vld [vmem:[#allocation10 + $0xf] ss:$0 sm:$0xff] }
 0xe38   : > { %3083 = vmatpush3.msra.mxu1 %v1695_v16  ;;  %v2048_v17 = vmul.f32 %v2044_v15, %v3823_v30 }
 0xe39   : > { %v3266_v18 = vpop.eup %3265  ;;  %3085 = vmatmul.mubr.msk.f32.vlgmr.msra.gmra.mxu1 %vm505_vm2, %v2047_v3  ;;  %3092 = vmatprep.subr.mxu1 %v3463_v11 }
 0xe3a   : > { %3090 = vmatmul.mubr.msk.f32.vlgmr.msra.gmra.mxu0 %vm505_vm2, %v2048_v17  ;;  %3093 = vmatpush3.msra.mxu1 %v1697_v19  ;;  %v2045_v20 = vmul.f32 %v3266_v18, %v3258_v61 }
 0xe3b   : > { %3094 = vmatprep.mubr.msk.f32.mxu1 %vm3464_vm1, %v3463_v11  ;;  %3105 = vmatprep.mubr.msk.f32.mxu0 %vm3464_vm1, %v3463_v11 }
 0xe3c   : > { %v2049_v21 = vmul.f32 %v2045_v20, %v3823_v30  ;;  %3108 = vmatprep.subr.mxu1 %v3463_v11  ;;  %3098 = vmatpush3.msra.mxu0 %v2847_v22  ;;  %v2845_v30 = vld [vmem:[%s4171_s5 + $0x28] sm:$0xff] }
 0xe3d   : > { %3099 = vmatprep.subr.mxu0 %v3463_v11 }
 0xe3e   : > { %3095 = vmatmul.mubr.msk.f32.vlgmr.msra.gmra.mxu1 %vm505_vm2, %v2049_v21  ;;  %3100 = vmatpush3.msra.mxu0 %v2846_v23 }
 0xe3f   : > { %3116 = vmatprep.mubr.msk.f32.mxu1 %vm3464_vm1, %v3463_v11  ;;  %3101 = vmatprep.subr.mxu0 %v3463_v11 }
 0xe40   : > { %3102 = vmatpush3.msra.mxu0 %v2845_v30  ;;  %3109 = vmatpush3.msra.mxu1 %v2855_v51 }
 0xe41   : > { %3103 = vmatprep.subr.mxu0 %v3463_v11  ;;  %3110 = vmatprep.subr.mxu1 %v3463_v11 }
 0xe42   : > { %3104 = vmatpush3.msra.mxu0 %v2844_v25  ;;  %v2868_v25 = vld [vmem:[#allocation10 + $0x10] ss:$0 sm:$0xff] }
 0xe43   : > { %3119 = vmatprep.subr.mxu0 %v3463_v11 }
 0xef5   : > { %v2119_v24 = vpop.f32.mrf.mxu0 }
 0xef6   : > { %2342 = vst.msk [vmem:[#allocation3] sm:$0xff] %vm505_vm2, %v2119_v24 }
 0xef7   : > { %v3081_v27 = vpop.f32.mrf.mxu0 }
 0xef9   : > { %v2192_v28 = vpop.f32.mrf.mxu1 }
 0xefa   : > { %v2265_v29 = vpop.f32.mrf.mxu0  ;;  %2344 = vrot.lane.b32.xlu0 %v2192_v28, %s4210_s3  ;;  %v2869_v28 = vld [vmem:[#allocation10 + $0x11] ss:$0 sm:$0xff]  ;;  %s2664_s3 = scalar_lea.sflag [#allocation6], %s3682_s0 }
 0xefb   : > { %2349 = vrot.lane.b32.xlu1 %v2265_v29, %s4211_s25  ;;  %v3086_v31 = vpop.f32.mrf.mxu1  ;;  %s3379_s25 = scalar_lea.vmem %s2678_s26, 128 }
 0xefc   : > { %v3091_v32 = vpop.f32.mrf.mxu0  ;;  %p3380_p6 = scmp.ne.s32.totalorder %s2678_s26, %s3379_s25 }
 0xefe   : > { %v2338_v33 = vpop.f32.mrf.mxu1  ;;  %p3381_p12 = pnand %p3380_p6, %p4214_p9 }
 0xeff   : > { %2354 = vrot.lane.b32.xlu0 %v2338_v33, %s4212_s19  ;;  %s3480_s19 = smov [#allocation12]  }
 0xf00   : > { %v3096_v34 = vpop.f32.mrf.mxu1  ;;  %p3382_p3 = pneg %p3381_p12  ;;  %s3383_s9 = sshll.u32 %s3480_s19, 4  ;;  %s3384_s9 = int_to_ptr.vmem [resolvable:$false] %s3383_s9 }
 0xf01   : > { %s3385_s23 = scalar_lea.vmem %s3384_s9, 256  ;;  %p3386_p7 = scmp.lt.s32.totalorder %s2678_s26, %s3384_s9 }
 0xf02   : > { %p3387_p13 = scmp.lt.s32.totalorder %s3385_s23, %s3379_s25 }
 0xf04   : > { %p3388_p10 = por %p3387_p13, %p3386_p7 }
 0xf06   : > { %p3389_p0 = pnand %p3388_p10, %p3382_p3 }
 0xf6c   : > { %v2345_v35 = vpop.permute.xlu0 %2344 }
 0xf6d   : > { %2347 = vst.msk [vmem:[#allocation3] sm:$0xff] %vm1236_vm4, %v2345_v35  ;;  %v2350_v26 = vpop.permute.xlu1 %2349 }
 0xf6e   : > { %2352 = vst.msk [vmem:[#allocation3] sm:$0xff] %vm1242_vm5, %v2350_v26 }
 0xf71   : > { %v2355_v36 = vpop.permute.xlu0 %2354 }
 0xf72   : > { %2357 = vst.msk [vmem:[#allocation3] sm:$0xff] %vm1248_vm6, %v2355_v36 }
 0xf79   : > { %v2358_v37 = vld [vmem:[#allocation3] sm:$0xff] }
 0xf7a   : > { %3106 = vmatmul.mubr.msk.f32.vlgmr.msra.gmra.mxu0 %vm399_vm0, %v2358_v37 }
 0xf7b   : > { %3135 = vmatprep.mubr.msk.f32.mxu0 %vm3464_vm1, %v3463_v11  ;;  %3120 = vmatpush3.msra.mxu0 %v2865_v53 }
 0xf7c   : > { %3121 = vmatprep.subr.mxu0 %v3463_v11 }
 0xf7d   : > { %3122 = vmatpush3.msra.mxu0 %v2864_v54 }
 0xf7e   : > { %3123 = vmatprep.subr.mxu0 %v3463_v11 }
 0xf7f   : > { %3124 = vmatpush3.msra.mxu0 %v2863_v55 }
 0xf80   : > { %3125 = vmatprep.subr.mxu0 %v3463_v11 }
 0xf81   : > { %3126 = vmatpush3.msra.mxu0 %v2862_v56 }
 0xf82   : > { %3127 = vmatprep.subr.mxu0 %v3463_v11 }
 0xf83   : > { %3128 = vmatpush3.msra.mxu0 %v2861_v57 }
 0xf84   : > { %3129 = vmatprep.subr.mxu0 %v3463_v11 }
 0xf85   : > { %3130 = vmatpush3.msra.mxu0 %v2860_v4 }
 0xf86   : > { %3131 = vmatprep.subr.mxu0 %v3463_v11 }
 0xf87   : > { %3132 = vmatpush3.msra.mxu0 %v2859_v5 }
 0xf88   : > { %3133 = vmatprep.subr.mxu0 %v3463_v11 }
 0xf89   : > { %3134 = vmatpush3.msra.mxu0 %v2858_v7 }
0x103a   : > { %v2433_v39 = vpop.f32.mrf.mxu0 }
0x103b   : > { %v2437_v40 = vadd.f32 %v2433_v39, %v3935_v46  ;;  %v2854_v46 = vld [vmem:[%s4172_s6 + $0x30] sm:$0xff] }
0x103c   : > { %v3107_v41 = vpop.f32.mrf.mxu0  ;;  %3111 = vmatpush3.msra.mxu1 %v2854_v46 }
0x103d   : > { %v2442_v42 = vadd.f32 %v2849_v38, %v2437_v40  ;;  %3112 = vmatprep.subr.mxu1 %v3463_v11 }
0x103e   : > { %3113 = vmatpush3.msra.mxu1 %v2853_v49 }
0x103f   : > { %v2443_v43 = vsel %vm399_vm0, %v2442_v42, 0.0  ;;  %3114 = vmatprep.subr.mxu1 %v3463_v11 }
0x1040   : > { %2444 = vadd.xlane.f32.xlu1 %v2443_v43  ;;  %3115 = vmatpush3.msra.mxu1 %v2852_v52 }
0x10c9   : > { %v2445_v44 = vpop.xlane.xlu1 %2444 }
0x10ca   : > { %v2446_v45 = vmul.f32 0.03125, %v2445_v44 }
0x10cc   : > { %v2447_v47 = vsub.f32 %v2442_v42, %v2446_v45 }
0x10ce   : > { %v2448_v48 = vmul.f32 %v2447_v47, %v2447_v47 }
0x10d0   : > { %v2449_v50 = vsel %vm399_vm0, %v2448_v48, 0.0 }
0x10d1   : > { %2450 = vadd.xlane.f32.xlu0 %v2449_v50 }
0x115a   : > { %v2451_v58 = vpop.xlane.xlu0 %2450 }
0x115b   : > { %v2452_v59 = vmul.f32 0.03125, %v2451_v58 }
0x115d   : > { %v2453_v60 = vadd.f32 1e-12, %v2452_v59 }
0x115f   : > { %3267 = vrsqrt.f32 %v2453_v60 }
0x116c   : > { %v3268_v61 = vpop.eup %3267 }
0x116d   : > { %v2455_v63 = vmul.f32 %v3268_v61, %v2447_v47 }
0x116f   : > { %v2460_v1 = vmul.f32 %v2850_v62, %v2455_v63 }
0x1171   : > { %v2465_v2 = vadd.f32 %v2851_v0, %v2460_v1 }
0x1173   : > { %3117 = vmatmul.mubr.msk.f32.vlgmr.msra.gmra.mxu1 %vm399_vm0, %v2465_v2 }
0x1233   : > { %v2544_v9 = vpop.f32.mrf.mxu1 }
0x1234   : > { %v2545_v6 = vadd.f32 %v2856_v8, %v2544_v9 }
0x1235   : > { %v3118_v10 = vpop.f32.mrf.mxu1 }
0x1236   : > { %v2548_v12 = vmax.f32 %v2545_v6, 0.0 }
0x1238   : > { %3136 = vmatmul.mubr.msk.f32.vlgmr.msra.gmra.mxu0 %vm1447_vm7, %v2548_v12 }
0x12f8   : > { %v2627_v13 = vpop.f32.mrf.mxu0 }
0x12f9   : > { %v2631_v15 = vadd.f32 %v2627_v13, %v2442_v42 }
0x12fa   : > { %v3137_v16 = vpop.f32.mrf.mxu0 }
0x12fb   : > { %v2636_v3 = vadd.f32 %v2867_v14, %v2631_v15 }
0x12fd   : > { %v2639_v17 = vsel %vm399_vm0, %v2636_v3, 0.0 }
0x12fe   : > { %2640 = vadd.xlane.f32.xlu0 %v2639_v17 }
0x1387   : > { %v2641_v18 = vpop.xlane.xlu0 %2640 }
0x1388   : > { %v2642_v11 = vmul.f32 0.03125, %v2641_v18 }
0x138a   : > { %v2643_v19 = vsub.f32 %v2636_v3, %v2642_v11 }
0x138c   : > { %v2644_v20 = vmul.f32 %v2643_v19, %v2643_v19 }
0x138e   : > { %v2645_v21 = vsel %vm399_vm0, %v2644_v20, 0.0 }
0x138f   : > { %2646 = vadd.xlane.f32.xlu1 %v2645_v21 }
0x1418   : > { %v2647_v22 = vpop.xlane.xlu1 %2646 }
0x1419   : > { %v2648_v23 = vmul.f32 0.03125, %v2647_v22 }
0x141b   : > { %v2649_v30 = vadd.f32 1e-12, %v2648_v23 }
0x141d   : > { %3269 = vrsqrt.f32 %v2649_v30 }
0x142a   : > { %v3270_v24 = vpop.eup %3269 }
0x142b   : > { %v2651_v27 = vmul.f32 %v3270_v24, %v2643_v19 }
0x142d   : > { %v2656_v29 = vmul.f32 %v2868_v25, %v2651_v27 }
0x142f   : > { %v2661_v31 = vadd.f32 %v2869_v28, %v2656_v29 }
0x1431   : > { %2662 = vst.msk [vmem:[%s381_s13] sm:$0xff] %vm399_vm0, %v2661_v31 }
0x1432   : > { %3392 = shalt.err (!%p3389_p0)
}
0x1433   : > { %s3393_s14 = scalar_lea.hbm %s2675_s20, 128  ;;  %s3397_s15 = scalar_lea.hbm %s4174_s8, 256 }
0x1434   : > { %p3394_p1 = scmp.ne.s32.totalorder %s2675_s20, %s3393_s14  ;;  %p3398_p11 = scmp.lt.s32.totalorder %s2675_s20, %s4174_s8 }
0x1435   : > { %p3399_p2 = scmp.lt.s32.totalorder %s3397_s15, %s3393_s14 }
0x1436   : > { %p3395_p5 = pnand %p3394_p1, %p4214_p9 }
0x1437   : > { %p3400_p4 = por %p3399_p2, %p3398_p11 }
0x1438   : > { %p3396_p8 = pneg %p3395_p5 }
0x143a   : > { %p3401_p6 = pnand %p3400_p4, %p3396_p8 }
0x143c   : > { %3404 = shalt.err (!%p3401_p6)
}
0x143d   : > { %3150 = dma.vmem_to_hbm [thread:$0]  (%p4214_p9), %s2678_s26, 128, %s2675_s20, %s2664_s3  }
0x143e PF: > { %s2689_s29 = sand.u32 1, %s3443_s27   ;;  %p4215_p12 = scmp.ne.s32.totalorder %s4191_s12, 0 }
0x143f   : > { %p4216_p3 = scmp.ge.s32.totalorder %s3455_s30, 2  ;;  %s2690_s24 = scalar_lea.sflag [#allocation6], %s2689_s29 }
0x1441   : > { %p3167_p7 = pnand %p4216_p3, %p4215_p12 }
0x1443   : > { %p3168_p13 = pneg %p3167_p7 }
0x1445   : > { %3438 = dma.done.wait (%p3168_p13), %s2690_s24, 128  }
0x1446   : > { %3440 = vsyncadd (%p3168_p13), %s2690_s24, 4294967168  ;;  %s4217_s17 = sld [smem:[#allocation18_spill]]  ;;  %p25_p10 = scmp.ge.s32.totalorder %s3598_s10, 4  }
0x1447   : > { %s4218_s29 = sld [smem:[#allocation19_spill]]  ;;  %s4219_s27 = smov %s3447_s28 }
0x1448   : > { %s4221_s30 = smov %s3598_s10  ;;  %27 = sbr.rel (!%p25_p10) target bundleno = 12 (0xc), region = 133 }
0x144c   : > { %s4220_s28 = smov %s4217_s17 }
0x144d   :  { %2695 = vsyncpa [#allocation5], 1 }
0x144e   :  { %2697 = vsyncpa [#allocation5 + $0x1], 1 }
0x144f   :  { %2698 = vsyncpa [#allocation8], 1 }
0x1450   :  { %2700 = vsyncpa [#allocation8 + $0x1], 1 }
0x1451   :  { %2701 = vsyncpa [#allocation11], 1 }
0x1452   :  { %2702 = vsyncpa [#allocation6], 1 }
0x1453   :  { %2704 = vsyncpa [#allocation6 + $0x1], 1 }

</bundles_post_ra>
